<compile_context>
chip_gen: v7x
topology: tpu7x:2x2x1
jax: 0.10.0
libtpu: 0.0.40
codegen_flags: <defaults>
</compile_context>

<pallas_src>
import jax
import jax.numpy as jnp
from jax.experimental import pallas as pl
from jax.experimental.pallas import tpu as pltpu

LANE = 128


def _round_up(n, m):
    return ((n + m - 1) // m) * m


def _pad2d(w, rows, cols):
    """Zero-pad a 2-D array up to (rows, cols)."""
    return jnp.zeros((rows, cols), w.dtype).at[: w.shape[0], : w.shape[1]].set(w)


def _mlp_kernel(x_ref,
                w1_ref, w2_ref, w3_ref, w4_ref, w5_ref, wo_ref,
                bias_ref,
                out_ref):
    # bias_ref is an (8, 512) f32 pack: rows 0..5 hold b1,b2,b3,b4,b5,bo
    # (each zero-padded on the right); rows 6,7 are unused padding.

    def dense(h, w_ref, b, relu=True):
        # bf16 operands (native MXU dtype), f32 accumulation.
        y = jnp.dot(h.astype(jnp.bfloat16), w_ref[...],
                    preferred_element_type=jnp.float32) + b
        return jnp.maximum(y, 0.0) if relu else y

    h = x_ref[...].astype(jnp.float32)               # (TB, Fp)
    h = dense(h, w1_ref, bias_ref[0:1, :512])        # (TB, 512)
    h = dense(h, w2_ref, bias_ref[1:2, :512])        # (TB, 512)
    h = dense(h, w3_ref, bias_ref[2:3, :512])        # (TB, 512)
    h = dense(h, w4_ref, bias_ref[3:4, :256])        # (TB, 256)
    h = dense(h, w5_ref, bias_ref[4:5, :128])        # (TB, 128)  (32 real + 96 zeros)
    out = dense(h, wo_ref, bias_ref[5:6, :128], relu=False)   # (TB, 128) (C real + zeros)
    out_ref[...] = out.astype(out_ref.dtype)


def simple_nn_forward(x, params):
    """x: (B, *rest) float.  params: list of 6 (W, b) pairs with W shaped (in, out)."""
    B = x.shape[0]
    x2d = x.reshape(B, -1).astype(jnp.float32)       # x.view(x.size(0), -1)
    F = x2d.shape[1]

    (w1, b1), (w2, b2), (w3, b3), (w4, b4), (w5, b5), (wo, bo) = params
    C = wo.shape[1]
    H5 = w5.shape[1]                                  # 32
    Fp = _round_up(max(F, LANE), LANE)                # e.g. 64 -> 128
    H5p = _round_up(max(H5, LANE), LANE)              # 32 -> 128
    Cp = _round_up(max(C, LANE), LANE)                # 4  -> 128

    # --- weights: zero-pad the narrow dims to lane multiples, cast to bf16 ---
    w1p = _pad2d(w1, Fp, 512).astype(jnp.bfloat16)    # (Fp, 512)
    w2p = w2.astype(jnp.bfloat16)                     # (512, 512)
    w3p = w3.astype(jnp.bfloat16)                     # (512, 512)
    w4p = w4.astype(jnp.bfloat16)                     # (512, 256)
    w5p = _pad2d(w5, 256, H5p).astype(jnp.bfloat16)   # (256, 128)
    wop = _pad2d(wo, H5p, Cp).astype(jnp.bfloat16)    # (128, 128)

    # --- all biases packed into a single (8, 512) f32 array (one small DMA) ---
    bias_pack = jnp.zeros((8, 512), jnp.float32)
    bias_pack = bias_pack.at[0, :512].set(b1)
    bias_pack = bias_pack.at[1, :512].set(b2)
    bias_pack = bias_pack.at[2, :512].set(b3)
    bias_pack = bias_pack.at[3, :256].set(b4)
    bias_pack = bias_pack.at[4, :H5].set(b5)
    bias_pack = bias_pack.at[5, :C].set(bo)

    # --- batch tiling: up to 256 rows per tile (matches v6e/v7x MXU height) ---
    TB = min(256, _round_up(B, 8))
    Bp = _round_up(B, TB)
    x_pad = jnp.zeros((Bp, Fp), jnp.float32).at[:B, :F].set(x2d)

    const_map = lambda i: (0, 0)                      # weights stay VMEM-resident
    out_pad = pl.pallas_call(
        _mlp_kernel,
        out_shape=jax.ShapeDtypeStruct((Bp, Cp), jnp.float32),
        grid=(Bp // TB,),
        in_specs=[
            pl.BlockSpec((TB, Fp), lambda i: (i, 0)),
            pl.BlockSpec(w1p.shape, const_map),
            pl.BlockSpec(w2p.shape, const_map),
            pl.BlockSpec(w3p.shape, const_map),
            pl.BlockSpec(w4p.shape, const_map),
            pl.BlockSpec(w5p.shape, const_map),
            pl.BlockSpec(wop.shape, const_map),
            pl.BlockSpec(bias_pack.shape, const_map),
        ],
        out_specs=pl.BlockSpec((TB, Cp), lambda i: (i, 0)),
        compiler_params=pltpu.CompilerParams(
            dimension_semantics=("parallel",)),       # uses both TCs on v7x
    )(x_pad, w1p, w2p, w3p, w4p, w5p, wop, bias_pack)

    return out_pad[:B, :C]


def init_params(key, input_dim, output_classes):
    """Deterministic init matching SimpleNN's layer shapes (not a checkpoint)."""
    dims = [input_dim, 512, 512, 512, 256, 32, output_classes]
    params = []
    for i in range(len(dims) - 1):
        fan_in, fan_out = dims[i], dims[i + 1]
        key, kw, kb = jax.random.split(key, 3)
        bound = 1.0 / jnp.sqrt(fan_in)
        # stored as (in, out) == transpose of PyTorch's nn.Linear weight
        w = jax.random.uniform(kw, (fan_in, fan_out), jnp.float32, -bound, bound)
        b = jax.random.uniform(kb, (fan_out,), jnp.float32, -bound, bound)
        params.append((w, b))
    return params


def _ref_forward(x, params):
    """Pure-JAX reference mirroring the kernel's bf16-weight / f32-accum math."""
    h = x.reshape(x.shape[0], -1).astype(jnp.float32)
    for i, (w, b) in enumerate(params):
        h = jnp.dot(h.astype(jnp.bfloat16), w.astype(jnp.bfloat16),
                    preferred_element_type=jnp.float32) + b
        if i < len(params) - 1:
            h = jnp.maximum(h, 0.0)
    return h


if __name__ == "__main__":
    key = jax.random.PRNGKey(0)
    k_x, k_p = jax.random.split(key)

    B = 2
    input_dim = 64          # input_shape = (64,)
    output_classes = 4

    x = jax.random.normal(k_x, (B, input_dim), dtype=jnp.float32)
    params = init_params(k_p, input_dim, output_classes)

    out = simple_nn_forward(x, params)
    out = jax.block_until_ready(out)

    assert out.shape == (B, output_classes), out.shape

    ref = _ref_forward(x, params)
    assert jnp.allclose(out, ref, atol=1e-2, rtol=1e-2), (
        float(jnp.max(jnp.abs(out - ref))))

    print("KERNEL_OK")
</pallas_src>

<mosaic_0001>
module attributes {stable_mosaic.version = 11 : i64} {
  func.func @_mlp_kernel(%arg0: i32, %arg1: memref<8x128xf32, #tpu.memory_space<vmem>>, %arg2: memref<128x512xbf16, #tpu.memory_space<vmem>>, %arg3: memref<512x512xbf16, #tpu.memory_space<vmem>>, %arg4: memref<512x512xbf16, #tpu.memory_space<vmem>>, %arg5: memref<512x256xbf16, #tpu.memory_space<vmem>>, %arg6: memref<256x128xbf16, #tpu.memory_space<vmem>>, %arg7: memref<128x128xbf16, #tpu.memory_space<vmem>>, %arg8: memref<8x512xf32, #tpu.memory_space<vmem>>, %arg9: memref<8x128xf32, #tpu.memory_space<vmem>>) attributes {dimension_semantics = [#tpu.dimension_semantics<parallel>], iteration_bounds = array<i64: 1>, scalar_prefetch = 0 : i64, scratch_operands = 0 : i64, tpu.core_type = #tpu.core_type<tc>, window_params = [{transform_indices = @transform_0, window_bounds = array<i64: 8, 128>}, {pipeline_mode = #tpu.pipeline_mode<synchronous>, transform_indices = @transform_1, window_bounds = array<i64: 128, 512>}, {pipeline_mode = #tpu.pipeline_mode<synchronous>, transform_indices = @transform_2, window_bounds = array<i64: 512, 512>}, {pipeline_mode = #tpu.pipeline_mode<synchronous>, transform_indices = @transform_3, window_bounds = array<i64: 512, 512>}, {pipeline_mode = #tpu.pipeline_mode<synchronous>, transform_indices = @transform_4, window_bounds = array<i64: 512, 256>}, {pipeline_mode = #tpu.pipeline_mode<synchronous>, transform_indices = @transform_5, window_bounds = array<i64: 256, 128>}, {pipeline_mode = #tpu.pipeline_mode<synchronous>, transform_indices = @transform_6, window_bounds = array<i64: 128, 128>}, {pipeline_mode = #tpu.pipeline_mode<synchronous>, transform_indices = @transform_7, window_bounds = array<i64: 8, 512>}, {transform_indices = @transform_8, window_bounds = array<i64: 8, 128>}]} {
    %c0 = arith.constant 0 : index
    %c0_0 = arith.constant 0 : index
    %0 = vector.load %arg1[%c0, %c0_0] : memref<8x128xf32, #tpu.memory_space<vmem>>, vector<8x128xf32>
    %c0_1 = arith.constant 0 : index
    %c0_2 = arith.constant 0 : index
    %1 = vector.load %arg8[%c0_1, %c0_2] : memref<8x512xf32, #tpu.memory_space<vmem>>, vector<1x512xf32>
    %2 = arith.truncf %0 : vector<8x128xf32> to vector<8x128xbf16>
    %c0_3 = arith.constant 0 : index
    %c0_4 = arith.constant 0 : index
    %3 = vector.load %arg2[%c0_3, %c0_4] : memref<128x512xbf16, #tpu.memory_space<vmem>>, vector<128x512xbf16>
    %cst = arith.constant dense<0.000000e+00> : vector<8x512xf32>
    %4 = tpu.matmul %2, %3, %cst {dimension_numbers = #tpu.dot_dimension_numbers<[1], [0], [0], [1], [0, 0, 1, 1], [], []>} : vector<8x128xbf16>, vector<128x512xbf16>, vector<8x512xf32> -> vector<8x512xf32>
    %5 = vector.broadcast %1 : vector<1x512xf32> to vector<8x512xf32>
    %6 = arith.addf %4, %5 : vector<8x512xf32>
    %cst_5 = arith.constant 0.000000e+00 : f32
    %7 = vector.broadcast %cst_5 : f32 to vector<8x512xf32>
    %8 = arith.maximumf %6, %7 : vector<8x512xf32>
    %c1 = arith.constant 1 : index
    %c0_6 = arith.constant 0 : index
    %9 = vector.load %arg8[%c1, %c0_6] : memref<8x512xf32, #tpu.memory_space<vmem>>, vector<1x512xf32>
    %10 = arith.truncf %8 : vector<8x512xf32> to vector<8x512xbf16>
    %c0_7 = arith.constant 0 : index
    %c0_8 = arith.constant 0 : index
    %11 = vector.load %arg3[%c0_7, %c0_8] : memref<512x512xbf16, #tpu.memory_space<vmem>>, vector<512x512xbf16>
    %cst_9 = arith.constant dense<0.000000e+00> : vector<8x512xf32>
    %12 = tpu.matmul %10, %11, %cst_9 {dimension_numbers = #tpu.dot_dimension_numbers<[1], [0], [0], [1], [0, 0, 1, 1], [], []>} : vector<8x512xbf16>, vector<512x512xbf16>, vector<8x512xf32> -> vector<8x512xf32>
    %13 = vector.broadcast %9 : vector<1x512xf32> to vector<8x512xf32>
    %14 = arith.addf %12, %13 : vector<8x512xf32>
    %cst_10 = arith.constant 0.000000e+00 : f32
    %15 = vector.broadcast %cst_10 : f32 to vector<8x512xf32>
    %16 = arith.maximumf %14, %15 : vector<8x512xf32>
    %c2 = arith.constant 2 : index
    %c0_11 = arith.constant 0 : index
    %17 = vector.load %arg8[%c2, %c0_11] : memref<8x512xf32, #tpu.memory_space<vmem>>, vector<1x512xf32>
    %18 = arith.truncf %16 : vector<8x512xf32> to vector<8x512xbf16>
    %c0_12 = arith.constant 0 : index
    %c0_13 = arith.constant 0 : index
    %19 = vector.load %arg4[%c0_12, %c0_13] : memref<512x512xbf16, #tpu.memory_space<vmem>>, vector<512x512xbf16>
    %cst_14 = arith.constant dense<0.000000e+00> : vector<8x512xf32>
    %20 = tpu.matmul %18, %19, %cst_14 {dimension_numbers = #tpu.dot_dimension_numbers<[1], [0], [0], [1], [0, 0, 1, 1], [], []>} : vector<8x512xbf16>, vector<512x512xbf16>, vector<8x512xf32> -> vector<8x512xf32>
    %21 = vector.broadcast %17 : vector<1x512xf32> to vector<8x512xf32>
    %22 = arith.addf %20, %21 : vector<8x512xf32>
    %cst_15 = arith.constant 0.000000e+00 : f32
    %23 = vector.broadcast %cst_15 : f32 to vector<8x512xf32>
    %24 = arith.maximumf %22, %23 : vector<8x512xf32>
    %c3 = arith.constant 3 : index
    %c0_16 = arith.constant 0 : index
    %25 = vector.load %arg8[%c3, %c0_16] : memref<8x512xf32, #tpu.memory_space<vmem>>, vector<1x256xf32>
    %26 = arith.truncf %24 : vector<8x512xf32> to vector<8x512xbf16>
    %c0_17 = arith.constant 0 : index
    %c0_18 = arith.constant 0 : index
    %27 = vector.load %arg5[%c0_17, %c0_18] : memref<512x256xbf16, #tpu.memory_space<vmem>>, vector<512x256xbf16>
    %cst_19 = arith.constant dense<0.000000e+00> : vector<8x256xf32>
    %28 = tpu.matmul %26, %27, %cst_19 {dimension_numbers = #tpu.dot_dimension_numbers<[1], [0], [0], [1], [0, 0, 1, 1], [], []>} : vector<8x512xbf16>, vector<512x256xbf16>, vector<8x256xf32> -> vector<8x256xf32>
    %29 = vector.broadcast %25 : vector<1x256xf32> to vector<8x256xf32>
    %30 = arith.addf %28, %29 : vector<8x256xf32>
    %cst_20 = arith.constant 0.000000e+00 : f32
    %31 = vector.broadcast %cst_20 : f32 to vector<8x256xf32>
    %32 = arith.maximumf %30, %31 : vector<8x256xf32>
    %c4 = arith.constant 4 : index
    %c0_21 = arith.constant 0 : index
    %33 = vector.load %arg8[%c4, %c0_21] : memref<8x512xf32, #tpu.memory_space<vmem>>, vector<1x128xf32>
    %34 = arith.truncf %32 : vector<8x256xf32> to vector<8x256xbf16>
    %c0_22 = arith.constant 0 : index
    %c0_23 = arith.constant 0 : index
    %35 = vector.load %arg6[%c0_22, %c0_23] : memref<256x128xbf16, #tpu.memory_space<vmem>>, vector<256x128xbf16>
    %cst_24 = arith.constant dense<0.000000e+00> : vector<8x128xf32>
    %36 = tpu.matmul %34, %35, %cst_24 {dimension_numbers = #tpu.dot_dimension_numbers<[1], [0], [0], [1], [0, 0, 1, 1], [], []>} : vector<8x256xbf16>, vector<256x128xbf16>, vector<8x128xf32> -> vector<8x128xf32>
    %37 = vector.broadcast %33 : vector<1x128xf32> to vector<8x128xf32>
    %38 = arith.addf %36, %37 : vector<8x128xf32>
    %cst_25 = arith.constant 0.000000e+00 : f32
    %39 = vector.broadcast %cst_25 : f32 to vector<8x128xf32>
    %40 = arith.maximumf %38, %39 : vector<8x128xf32>
    %c5 = arith.constant 5 : index
    %c0_26 = arith.constant 0 : index
    %41 = vector.load %arg8[%c5, %c0_26] : memref<8x512xf32, #tpu.memory_space<vmem>>, vector<1x128xf32>
    %42 = arith.truncf %40 : vector<8x128xf32> to vector<8x128xbf16>
    %c0_27 = arith.constant 0 : index
    %c0_28 = arith.constant 0 : index
    %43 = vector.load %arg7[%c0_27, %c0_28] : memref<128x128xbf16, #tpu.memory_space<vmem>>, vector<128x128xbf16>
    %cst_29 = arith.constant dense<0.000000e+00> : vector<8x128xf32>
    %44 = tpu.matmul %42, %43, %cst_29 {dimension_numbers = #tpu.dot_dimension_numbers<[1], [0], [0], [1], [0, 0, 1, 1], [], []>} : vector<8x128xbf16>, vector<128x128xbf16>, vector<8x128xf32> -> vector<8x128xf32>
    %45 = vector.broadcast %41 : vector<1x128xf32> to vector<8x128xf32>
    %46 = arith.addf %44, %45 : vector<8x128xf32>
    %c0_30 = arith.constant 0 : index
    %c0_31 = arith.constant 0 : index
    %47 = vector.load %arg9[%c0_30, %c0_31] : memref<8x128xf32, #tpu.memory_space<vmem>>, vector<8x128xf32>
    tpu.vector_store %arg9[%c0_30, %c0_31], %46 {strides = array<i32>} : memref<8x128xf32, #tpu.memory_space<vmem>>, vector<8x128xf32>,
    return
  }
  func.func @transform_0(%arg0: i32) -> (i32, i32) {
    %c0_i32 = arith.constant 0 : i32
    %c0_i32_0 = arith.constant 0 : i32
    return %arg0, %c0_i32 : i32, i32
  }
  func.func @transform_1(%arg0: i32) -> (i32, i32) {
    %c0_i32 = arith.constant 0 : i32
    %c0_i32_0 = arith.constant 0 : i32
    %c0_i32_1 = arith.constant 0 : i32
    return %c0_i32, %c0_i32_0 : i32, i32
  }
  func.func @transform_2(%arg0: i32) -> (i32, i32) {
    %c0_i32 = arith.constant 0 : i32
    %c0_i32_0 = arith.constant 0 : i32
    %c0_i32_1 = arith.constant 0 : i32
    return %c0_i32, %c0_i32_0 : i32, i32
  }
  func.func @transform_3(%arg0: i32) -> (i32, i32) {
    %c0_i32 = arith.constant 0 : i32
    %c0_i32_0 = arith.constant 0 : i32
    %c0_i32_1 = arith.constant 0 : i32
    return %c0_i32, %c0_i32_0 : i32, i32
  }
  func.func @transform_4(%arg0: i32) -> (i32, i32) {
    %c0_i32 = arith.constant 0 : i32
    %c0_i32_0 = arith.constant 0 : i32
    %c0_i32_1 = arith.constant 0 : i32
    return %c0_i32, %c0_i32_0 : i32, i32
  }
  func.func @transform_5(%arg0: i32) -> (i32, i32) {
    %c0_i32 = arith.constant 0 : i32
    %c0_i32_0 = arith.constant 0 : i32
    %c0_i32_1 = arith.constant 0 : i32
    return %c0_i32, %c0_i32_0 : i32, i32
  }
  func.func @transform_6(%arg0: i32) -> (i32, i32) {
    %c0_i32 = arith.constant 0 : i32
    %c0_i32_0 = arith.constant 0 : i32
    %c0_i32_1 = arith.constant 0 : i32
    return %c0_i32, %c0_i32_0 : i32, i32
  }
  func.func @transform_7(%arg0: i32) -> (i32, i32) {
    %c0_i32 = arith.constant 0 : i32
    %c0_i32_0 = arith.constant 0 : i32
    %c0_i32_1 = arith.constant 0 : i32
    return %c0_i32, %c0_i32_0 : i32, i32
  }
  func.func @transform_8(%arg0: i32) -> (i32, i32) {
    %c0_i32 = arith.constant 0 : i32
    %c0_i32_0 = arith.constant 0 : i32
    return %arg0, %c0_i32 : i32, i32
  }
}

</mosaic_0001>

<bundles_post_ra>
// kernel: tpu_custom_call.1
= control target key start
LH: loop header
LB: loop body
LE: loop exit
PB: predicated region body
PF: predicated region fallthrough
CT: control target
= control target key end

     0   :  { %13 = vsyncpa [#allocation3], 0  ;;  %s4629_s0 = inlined_call_operand.hbm [shape: f32[8,128], index: 0, kind: input, shape index: {}]   ;;  %s4630_s1 = inlined_call_operand.hbm [shape: bf16[128,512], index: 1, kind: input, shape index: {}]   ;;  %s4631_s2 = inlined_call_operand.hbm [shape: bf16[512,512], index: 2, kind: input, shape index: {}]   ;;  %s4632_s3 = inlined_call_operand.hbm [shape: bf16[512,512], index: 3, kind: input, shape index: {}]   ;;  %s4633_s4 = inlined_call_operand.hbm [shape: bf16[512,256], index: 4, kind: input, shape index: {}]   ;;  %s4634_s5 = inlined_call_operand.hbm [shape: bf16[256,128], index: 5, kind: input, shape index: {}]   ;;  %s4635_s6 = inlined_call_operand.hbm [shape: bf16[128,128], index: 6, kind: input, shape index: {}]   ;;  %s4636_s7 = inlined_call_operand.hbm [shape: f32[8,512], index: 7, kind: input, shape index: {}]   ;;  %s4637_s8 = inlined_call_operand.hbm [shape: f32[8,128], index: 8, kind: output, shape index: {}]  }
   0x1   :  { %14 = vsyncpa [#allocation6], 0 }
   0x2   :  { %15 = vsyncpa [#allocation9], 0 }
   0x3   :  { %16 = vsyncpa [#allocation12], 0 }
   0x4   :  { %17 = vsyncpa [#allocation15], 0 }
   0x5   :  { %18 = vsyncpa [#allocation4], 0  ;;  %s4384_s27 = smov [#allocation5]   ;;  %s4174_s9 = scalar_lea.hbm %s4630_s1, 4096 }
   0x6   :  { %s34_s28 = sshll.u32 %s4384_s27, 4  ;;  %p4175_p0 = scmp.ne.s32.totalorder %s4630_s1, %s4174_s9  ;;  %s35_s28 = int_to_ptr.vmem [resolvable:$true] %s34_s28 }
   0x7   :  { %p4178_p1 = scmp.lt.u32.totalorder %s4174_s9, %s4630_s1 }
   0x9   :  { %p4180_p2 = pnand %p4178_p1, %p4175_p0 }
   0xb   :  { %4183 = shalt.err (!%p4180_p2)
}
   0xc   :  { %s4184_s14 = scalar_lea.vmem %s35_s28, 4096  ;;  %p4189_p4 = scmp.lt.s32.totalorder %s35_s28, %s35_s28 }
   0xd   :  { %p4185_p3 = scmp.ne.s32.totalorder %s35_s28, %s4184_s14  ;;  %p4190_p5 = scmp.lt.s32.totalorder %s4184_s14, %s4184_s14 }
   0xf   :  { %p4191_p6 = por %p4190_p5, %p4189_p4 }
  0x11   :  { %p4192_p7 = pnand %p4191_p6, %p4185_p3 }
  0x13   :  { %4195 = shalt.err (!%p4192_p7)
}
  0x14   :  { %s4385_s15 = smov 256   ;;  %s4386_s16 = smov 16  }
  0x15   :  { %40 = dma.hbm_to_vmem [thread:$0]  %s4630_s1, 4096, %s35_s28, [#allocation6], %s4385_s15, %s4385_s15, %s4386_s16  }
  0x16   :  { %s4387_s19 = smov [#allocation8]   ;;  %s4388_s21 = smov [#allocation11]  }
  0x17   :  { %s58_s20 = sshll.u32 %s4387_s19, 4  ;;  %s82_s22 = sshll.u32 %s4388_s21, 4  ;;  %s59_s20 = int_to_ptr.vmem [resolvable:$true] %s58_s20  ;;  %s83_s22 = int_to_ptr.vmem [resolvable:$true] %s82_s22 }
  0x18   :  { %s4196_s25 = scalar_lea.hbm %s4632_s3, 16384 }
  0x19   :  { %p4197_p8 = scmp.ne.s32.totalorder %s4632_s3, %s4196_s25  ;;  %p4200_p9 = scmp.lt.u32.totalorder %s4196_s25, %s4632_s3 }
  0x1b   :  { %p4202_p10 = pnand %p4200_p9, %p4197_p8 }
  0x1d   :  { %4205 = shalt.err (!%p4202_p10)
}
  0x1e   :  { %s4206_s1 = scalar_lea.vmem %s59_s20, 16384  ;;  %p4211_p12 = scmp.lt.s32.totalorder %s59_s20, %s59_s20 }
  0x1f   :  { %p4207_p11 = scmp.ne.s32.totalorder %s59_s20, %s4206_s1  ;;  %p4212_p13 = scmp.lt.s32.totalorder %s4206_s1, %s4206_s1 }
  0x21   :  { %p4213_p0 = por %p4212_p13, %p4211_p12 }
  0x23   :  { %p4214_p1 = pnand %p4213_p0, %p4207_p11 }
  0x25   :  { %4217 = shalt.err (!%p4214_p1)
}
  0x26   :  { %64 = dma.hbm_to_vmem [thread:$0]  %s4632_s3, 16384, %s59_s20, [#allocation9], %s4385_s15, %s4385_s15, %s4386_s16  }
  0x27   :  { %s4218_s12 = scalar_lea.hbm %s4634_s5, 2048 }
  0x28   :  { %p4219_p2 = scmp.ne.s32.totalorder %s4634_s5, %s4218_s12  ;;  %p4222_p3 = scmp.lt.u32.totalorder %s4218_s12, %s4634_s5 }
  0x2a   :  { %p4224_p4 = pnand %p4222_p3, %p4219_p2 }
  0x2c   :  { %4227 = shalt.err (!%p4224_p4)
}
  0x2d   :  { %s4228_s19 = scalar_lea.vmem %s83_s22, 2048  ;;  %p4233_p6 = scmp.lt.s32.totalorder %s83_s22, %s83_s22 }
  0x2e   :  { %p4229_p5 = scmp.ne.s32.totalorder %s83_s22, %s4228_s19  ;;  %p4234_p7 = scmp.lt.s32.totalorder %s4228_s19, %s4228_s19 }
  0x30   :  { %p4235_p8 = por %p4234_p7, %p4233_p6 }
  0x32   :  { %p4236_p9 = pnand %p4235_p8, %p4229_p5 }
  0x34   :  { %4239 = shalt.err (!%p4236_p9)
}
  0x35   :  { %s4389_s3 = smov 64   ;;  %s4390_s20 = smov 4  }
  0x36   :  { %88 = dma.hbm_to_vmem [thread:$0]  %s4634_s5, 2048, %s83_s22, [#allocation12], %s4389_s3, %s4389_s3, %s4390_s20  }
  0x37   :  { %s4391_s24 = smov [#allocation2]   ;;  %s4392_s26 = smov [#allocation7]  }
  0x38   :  { %s25_s25 = sshll.u32 %s4391_s24, 4  ;;  %s46_s27 = sshll.u32 %s4392_s26, 4  ;;  %s26_s25 = int_to_ptr.vmem [resolvable:$true] %s25_s25  ;;  %s47_s27 = int_to_ptr.vmem [resolvable:$true] %s46_s27 }
  0x39   :  { %s4240_s1 = scalar_lea.hbm %s4629_s0, 128 }
  0x3a   :  { %p4241_p10 = scmp.ne.s32.totalorder %s4629_s0, %s4240_s1  ;;  %p4244_p11 = scmp.lt.u32.totalorder %s4240_s1, %s4629_s0 }
  0x3c   :  { %p4246_p12 = pnand %p4244_p11, %p4241_p10 }
  0x3e   :  { %4249 = shalt.err (!%p4246_p12)
}
  0x3f   :  { %s4250_s5 = scalar_lea.vmem %s26_s25, 128  ;;  %p4255_p0 = scmp.lt.s32.totalorder %s26_s25, %s26_s25 }
  0x40   :  { %p4251_p13 = scmp.ne.s32.totalorder %s26_s25, %s4250_s5  ;;  %p4256_p1 = scmp.lt.s32.totalorder %s4250_s5, %s4250_s5 }
  0x42   :  { %p4257_p2 = por %p4256_p1, %p4255_p0 }
  0x44   :  { %p4258_p3 = pnand %p4257_p2, %p4251_p13 }
  0x46   :  { %4261 = shalt.err (!%p4258_p3)
}
  0x47   :  { %28 = dma.hbm_to_vmem [thread:$0]  %s4629_s0, 128, %s26_s25, [#allocation3]  }
  0x48   :  { %s4262_s17 = scalar_lea.hbm %s4631_s2, 16384 }
  0x49   :  { %p4263_p4 = scmp.ne.s32.totalorder %s4631_s2, %s4262_s17  ;;  %p4266_p5 = scmp.lt.u32.totalorder %s4262_s17, %s4631_s2 }
  0x4b   :  { %p4268_p6 = pnand %p4266_p5, %p4263_p4 }
  0x4d   :  { %4271 = shalt.err (!%p4268_p6)
}
  0x4e   :  { %s4272_s24 = scalar_lea.vmem %s47_s27, 16384  ;;  %p4277_p8 = scmp.lt.s32.totalorder %s47_s27, %s47_s27 }
  0x4f   :  { %p4273_p7 = scmp.ne.s32.totalorder %s47_s27, %s4272_s24  ;;  %p4278_p9 = scmp.lt.s32.totalorder %s4272_s24, %s4272_s24 }
  0x51   :  { %p4279_p10 = por %p4278_p9, %p4277_p8 }
  0x53   :  { %p4280_p11 = pnand %p4279_p10, %p4273_p7 }
  0x55   :  { %4283 = shalt.err (!%p4280_p11)
}
  0x56   :  { %52 = dma.hbm_to_vmem [thread:$0]  %s4631_s2, 16384, %s47_s27, [#allocation6], %s4385_s15, %s4385_s15, %s4386_s16  }
  0x57   :  { %s4393_s26 = smov [#allocation10]   ;;  %s4284_s28 = scalar_lea.hbm %s4633_s4, 8192 }
  0x58   :  { %s70_s29 = sshll.u32 %s4393_s26, 4  ;;  %p4285_p12 = scmp.ne.s32.totalorder %s4633_s4, %s4284_s28  ;;  %s71_s29 = int_to_ptr.vmem [resolvable:$true] %s70_s29 }
  0x59   :  { %p4288_p13 = scmp.lt.u32.totalorder %s4284_s28, %s4633_s4 }
  0x5b   :  { %p4290_p0 = pnand %p4288_p13, %p4285_p12 }
  0x5d   :  { %4293 = shalt.err (!%p4290_p0)
}
  0x5e   :  { %s4294_s22 = scalar_lea.vmem %s71_s29, 8192  ;;  %p4299_p2 = scmp.lt.s32.totalorder %s71_s29, %s71_s29 }
  0x5f   :  { %p4295_p1 = scmp.ne.s32.totalorder %s71_s29, %s4294_s22  ;;  %p4300_p3 = scmp.lt.s32.totalorder %s4294_s22, %s4294_s22 }
  0x61   :  { %p4301_p4 = por %p4300_p3, %p4299_p2 }
  0x63   :  { %p4302_p5 = pnand %p4301_p4, %p4295_p1 }
  0x65   :  { %4305 = shalt.err (!%p4302_p5)
}
  0x66   :  { %s4394_s2 = smov 128   ;;  %s4395_s15 = smov 8  }
  0x67   :  { %76 = dma.hbm_to_vmem [thread:$0]  %s4633_s4, 8192, %s71_s29, [#allocation9], %s4394_s2, %s4394_s2, %s4395_s15  }
  0x68   :  { %s4396_s12 = smov [#allocation13]   ;;  %s4397_s14 = smov [#allocation14]  }
  0x69   :  { %s94_s13 = sshll.u32 %s4396_s12, 4  ;;  %s107_s17 = sshll.u32 %s4397_s14, 4  ;;  %s95_s13 = int_to_ptr.vmem [resolvable:$true] %s94_s13  ;;  %s108_s17 = int_to_ptr.vmem [resolvable:$true] %s107_s17 }
  0x6a   :  { %s4306_s21 = scalar_lea.hbm %s4635_s6, 1024 }
  0x6b   :  { %p4307_p6 = scmp.ne.s32.totalorder %s4635_s6, %s4306_s21  ;;  %p4310_p7 = scmp.lt.u32.totalorder %s4306_s21, %s4635_s6 }
  0x6d   :  { %p4312_p8 = pnand %p4310_p7, %p4307_p6 }
  0x6f   :  { %4315 = shalt.err (!%p4312_p8)
}
  0x70   :  { %s4316_s4 = scalar_lea.vmem %s95_s13, 1024  ;;  %p4321_p10 = scmp.lt.s32.totalorder %s95_s13, %s95_s13 }
  0x71   :  { %p4317_p9 = scmp.ne.s32.totalorder %s95_s13, %s4316_s4  ;;  %p4322_p11 = scmp.lt.s32.totalorder %s4316_s4, %s4316_s4 }
  0x73   :  { %p4323_p12 = por %p4322_p11, %p4321_p10 }
  0x75   :  { %p4324_p13 = pnand %p4323_p12, %p4317_p9 }
  0x77   :  { %4327 = shalt.err (!%p4324_p13)
}
  0x78   :  { %100 = dma.hbm_to_vmem [thread:$0]  %s4635_s6, 1024, %s95_s13, [#allocation12], %s4389_s3, %s4389_s3, %s4390_s20  }
  0x79   :  { %s4328_s28 = scalar_lea.hbm %s4636_s7, 512 }
  0x7a   :  { %p4329_p0 = scmp.ne.s32.totalorder %s4636_s7, %s4328_s28  ;;  %p4332_p1 = scmp.lt.u32.totalorder %s4328_s28, %s4636_s7 }
  0x7c   :  { %p4334_p2 = pnand %p4332_p1, %p4329_p0 }
  0x7e   :  { %4337 = shalt.err (!%p4334_p2)
}
  0x7f   :  { %s4338_s22 = scalar_lea.vmem %s108_s17, 512  ;;  %p4343_p4 = scmp.lt.s32.totalorder %s108_s17, %s108_s17 }
  0x80   :  { %p4339_p3 = scmp.ne.s32.totalorder %s108_s17, %s4338_s22  ;;  %p4344_p5 = scmp.lt.s32.totalorder %s4338_s22, %s4338_s22 }
  0x82   :  { %p4345_p6 = por %p4344_p5, %p4343_p4 }
  0x84   :  { %p4346_p7 = pnand %p4345_p6, %p4339_p3 }
  0x86   :  { %4349 = shalt.err (!%p4346_p7)
}
  0x87   :  { %110 = dma.hbm_to_vmem [thread:$0]  %s4636_s7, 512, %s108_s17, [#allocation15]  }
  0x88   :  { %4372 = dma.done.wait [#allocation3], 128  }
  0x89   :  { %4373 = vsyncadd [#allocation3], 4294967168 }
  0x8a   :  { %4374 = dma.done.wait [#allocation6], 20480  }
  0x8b   :  { %4375 = vsyncadd [#allocation6], 4294946816 }
  0x8c   :  { %4376 = dma.done.wait [#allocation9], 24576  }
  0x8d   :  { %4377 = vsyncadd [#allocation9], 4294942720 }
  0x8e   :  { %4378 = dma.done.wait [#allocation12], 3072  }
  0x8f   :  { %4379 = vsyncadd [#allocation12], 4294964224 }
  0x90   :  { %4380 = dma.done.wait [#allocation15], 512  }
  0x91   :  { %4381 = vsyncadd [#allocation15], 4294966784  ;;  %v4398_v0 = vmov 0   ;;  %v3622_v1 = vld [vmem:[#allocation5 + $0x4] ss:$16 sps:$4 sm:$0xff]   ;;  %v136_v20 = vld [vmem:[#allocation2] sm:$0xff] }
  0x92   :  { %384 = vmatprep.mubr.bf16.mxu1 %v4398_v0  ;;  %v3624_v2 = vld [vmem:[#allocation5] ss:$16 sps:$4 sm:$0xff]   ;;  %352 = vmatprep.subr.bf16.mxu1 %v3622_v1  ;;  %v3625_v3 = vld [vmem:[#allocation5 + $0x24] ss:$16 sps:$4 sm:$0xff]   ;;  %v3648_v23 = vld [vmem:[#allocation5 + $0xc] ss:$16 sps:$4 sm:$0xff]   ;;  %v4558_v24 = vpack.c.bf16 %v136_v20, %v136_v20 }
  0x93   :  { %353 = vmatpush1.bf16.msra.mxu1 %v3624_v2  ;;  %v3627_v4 = vld [vmem:[#allocation5 + $0x20] ss:$16 sps:$4 sm:$0xff]   ;;  %v3628_v5 = vld [vmem:[#allocation5 + $0x44] ss:$16 sps:$4 sm:$0xff]   ;;  %v3646_v26 = vld [vmem:[#allocation5 + $0x8] ss:$16 sps:$4 sm:$0xff]  }
  0x94   :  { %354 = vmatprep.subr.bf16.mxu1 %v3625_v3  ;;  %v3630_v6 = vld [vmem:[#allocation5 + $0x40] ss:$16 sps:$4 sm:$0xff]   ;;  %v3631_v7 = vld [vmem:[#allocation5 + $0x64] ss:$16 sps:$4 sm:$0xff]   ;;  %v3651_v27 = vld [vmem:[#allocation5 + $0x2c] ss:$16 sps:$4 sm:$0xff]  }
  0x95   :  { %v3633_v8 = vld [vmem:[#allocation5 + $0x60] ss:$16 sps:$4 sm:$0xff]   ;;  %v3634_v9 = vld [vmem:[#allocation5 + $0x84] ss:$16 sps:$4 sm:$0xff]   ;;  %v3649_v29 = vld [vmem:[#allocation5 + $0x28] ss:$16 sps:$4 sm:$0xff]  }
  0x96   :  { %v3636_v10 = vld [vmem:[#allocation5 + $0x80] ss:$16 sps:$4 sm:$0xff]   ;;  %v3637_v11 = vld [vmem:[#allocation5 + $0xa4] ss:$16 sps:$4 sm:$0xff]   ;;  %v3654_v32 = vld [vmem:[#allocation5 + $0x4c] ss:$16 sps:$4 sm:$0xff]  }
  0x97   :  { %355 = vmatpush1.bf16.msra.mxu1 %v3627_v4  ;;  %v3639_v12 = vld [vmem:[#allocation5 + $0xa0] ss:$16 sps:$4 sm:$0xff]   ;;  %v3640_v13 = vld [vmem:[#allocation5 + $0xc4] ss:$16 sps:$4 sm:$0xff]   ;;  %v3652_v34 = vld [vmem:[#allocation5 + $0x48] ss:$16 sps:$4 sm:$0xff]  }
  0x98   :  { %356 = vmatprep.subr.bf16.mxu1 %v3628_v5  ;;  %v3670_v14 = vld [vmem:[#allocation7 + $0x4] ss:$16 sps:$4 sm:$0xff]   ;;  %v3642_v15 = vld [vmem:[#allocation5 + $0xc0] ss:$16 sps:$4 sm:$0xff]   ;;  %v3657_v36 = vld [vmem:[#allocation5 + $0x6c] ss:$16 sps:$4 sm:$0xff]  }
  0x99   :  { %v3643_v16 = vld [vmem:[#allocation5 + $0xe4] ss:$16 sps:$4 sm:$0xff]   ;;  %1233 = vmatprep.subr.bf16.mxu0 %v3670_v14  ;;  %v3675_v17 = vld [vmem:[#allocation7] ss:$16 sps:$4 sm:$0xff]   ;;  %v3655_v37 = vld [vmem:[#allocation5 + $0x68] ss:$16 sps:$4 sm:$0xff]  }
  0x9a   :  { %v3676_v18 = vld [vmem:[#allocation7 + $0x24] ss:$16 sps:$4 sm:$0xff]   ;;  %v3645_v19 = vld [vmem:[#allocation5 + $0xe0] ss:$16 sps:$4 sm:$0xff]   ;;  %1234 = vmatpush1.bf16.msra.mxu0 %v3675_v17  ;;  %v3660_v40 = vld [vmem:[#allocation5 + $0x8c] ss:$16 sps:$4 sm:$0xff]  }
  0x9b   :  { %357 = vmatpush1.bf16.msra.mxu1 %v3630_v6  ;;  %v3681_v21 = vld [vmem:[#allocation7 + $0x20] ss:$16 sps:$4 sm:$0xff]   ;;  %1235 = vmatprep.subr.bf16.mxu0 %v3676_v18  ;;  %v3682_v22 = vld [vmem:[#allocation7 + $0x44] ss:$16 sps:$4 sm:$0xff]   ;;  %v3658_v42 = vld [vmem:[#allocation5 + $0x88] ss:$16 sps:$4 sm:$0xff]  }
  0x9c   :  { %358 = vmatprep.subr.bf16.mxu1 %v3631_v7  ;;  %v3687_v25 = vld [vmem:[#allocation7 + $0x40] ss:$16 sps:$4 sm:$0xff]   ;;  %v3688_v28 = vld [vmem:[#allocation7 + $0x64] ss:$16 sps:$4 sm:$0xff]   ;;  %v3663_v44 = vld [vmem:[#allocation5 + $0xac] ss:$16 sps:$4 sm:$0xff]  }
  0x9d   :  { %v3693_v30 = vld [vmem:[#allocation7 + $0x60] ss:$16 sps:$4 sm:$0xff]   ;;  %v3694_v31 = vld [vmem:[#allocation7 + $0x84] ss:$16 sps:$4 sm:$0xff]   ;;  %v3661_v45 = vld [vmem:[#allocation5 + $0xa8] ss:$16 sps:$4 sm:$0xff]  }
  0x9e   :  { %1236 = vmatpush1.bf16.msra.mxu0 %v3681_v21  ;;  %v3699_v33 = vld [vmem:[#allocation7 + $0x80] ss:$16 sps:$4 sm:$0xff]   ;;  %v3700_v35 = vld [vmem:[#allocation7 + $0xa4] ss:$16 sps:$4 sm:$0xff]   ;;  %v3666_v48 = vld [vmem:[#allocation5 + $0xcc] ss:$16 sps:$4 sm:$0xff]  }
  0x9f   :  { %359 = vmatpush1.bf16.msra.mxu1 %v3633_v8  ;;  %1237 = vmatprep.subr.bf16.mxu0 %v3682_v22  ;;  %v3705_v38 = vld [vmem:[#allocation7 + $0xa0] ss:$16 sps:$4 sm:$0xff]   ;;  %v3706_v39 = vld [vmem:[#allocation7 + $0xc4] ss:$16 sps:$4 sm:$0xff]   ;;  %v3664_v50 = vld [vmem:[#allocation5 + $0xc8] ss:$16 sps:$4 sm:$0xff]  }
  0xa0   :  { %360 = vmatprep.subr.bf16.mxu1 %v3634_v9  ;;  %v3711_v41 = vld [vmem:[#allocation7 + $0xc0] ss:$16 sps:$4 sm:$0xff]   ;;  %v3712_v43 = vld [vmem:[#allocation7 + $0xe4] ss:$16 sps:$4 sm:$0xff]   ;;  %v3669_v52 = vld [vmem:[#allocation5 + $0xec] ss:$16 sps:$4 sm:$0xff]  }
  0xa1   :  { %v3717_v46 = vld [vmem:[#allocation7 + $0xe0] ss:$16 sps:$4 sm:$0xff]   ;;  %v3718_v47 = vld [vmem:[#allocation7 + $0x104] ss:$16 sps:$4 sm:$0xff]   ;;  %v3667_v53 = vld [vmem:[#allocation5 + $0xe8] ss:$16 sps:$4 sm:$0xff]  }
  0xa2   :  { %1238 = vmatpush1.bf16.msra.mxu0 %v3687_v25  ;;  %v3723_v49 = vld [vmem:[#allocation7 + $0x100] ss:$16 sps:$4 sm:$0xff]   ;;  %v3724_v51 = vld [vmem:[#allocation7 + $0x124] ss:$16 sps:$4 sm:$0xff]   ;;  %v3674_v54 = vld [vmem:[#allocation7 + $0xc] ss:$16 sps:$4 sm:$0xff]  }
  0xa3   :  { %361 = vmatpush1.bf16.msra.mxu1 %v3636_v10  ;;  %1239 = vmatprep.subr.bf16.mxu0 %v3688_v28  ;;  %v3729_v55 = vld [vmem:[#allocation7 + $0x120] ss:$16 sps:$4 sm:$0xff]   ;;  %v3730_v56 = vld [vmem:[#allocation7 + $0x144] ss:$16 sps:$4 sm:$0xff]   ;;  %v3672_v58 = vld [vmem:[#allocation7 + $0x8] ss:$16 sps:$4 sm:$0xff]  }
  0xa4   :  { %362 = vmatprep.subr.bf16.mxu1 %v3637_v11  ;;  %v3735_v57 = vld [vmem:[#allocation7 + $0x140] ss:$16 sps:$4 sm:$0xff]   ;;  %v3736_v59 = vld [vmem:[#allocation7 + $0x164] ss:$16 sps:$4 sm:$0xff]   ;;  %v3680_v60 = vld [vmem:[#allocation7 + $0x2c] ss:$16 sps:$4 sm:$0xff]  }
  0xa5   :  { %v3741_v61 = vld [vmem:[#allocation7 + $0x160] ss:$16 sps:$4 sm:$0xff]   ;;  %v3678_v62 = vld [vmem:[#allocation7 + $0x28] ss:$16 sps:$4 sm:$0xff]   ;;  %v3742_v63 = vld [vmem:[#allocation7 + $0x184] ss:$16 sps:$4 sm:$0xff]  }
  0xa6   :  { %1240 = vmatpush1.bf16.msra.mxu0 %v3693_v30  ;;  %v3747_v1 = vld [vmem:[#allocation7 + $0x180] ss:$16 sps:$4 sm:$0xff]   ;;  %v3684_v2 = vld [vmem:[#allocation7 + $0x48] ss:$16 sps:$4 sm:$0xff]   ;;  %v3748_v3 = vld [vmem:[#allocation7 + $0x1a4] ss:$16 sps:$4 sm:$0xff]  }
  0xa7   :  { %363 = vmatpush1.bf16.msra.mxu1 %v3639_v12  ;;  %1241 = vmatprep.subr.bf16.mxu0 %v3694_v31  ;;  %v3692_v4 = vld [vmem:[#allocation7 + $0x6c] ss:$16 sps:$4 sm:$0xff]   ;;  %v3753_v5 = vld [vmem:[#allocation7 + $0x1a0] ss:$16 sps:$4 sm:$0xff]   ;;  %v3690_v6 = vld [vmem:[#allocation7 + $0x68] ss:$16 sps:$4 sm:$0xff]  }
  0xa8   :  { %364 = vmatprep.subr.bf16.mxu1 %v3640_v13  ;;  %v3698_v7 = vld [vmem:[#allocation7 + $0x8c] ss:$16 sps:$4 sm:$0xff]   ;;  %v3696_v8 = vld [vmem:[#allocation7 + $0x88] ss:$16 sps:$4 sm:$0xff]   ;;  %v3760_v31 = vld [vmem:[#allocation7 + $0x1e4] ss:$16 sps:$4 sm:$0xff]  }
  0xa9   :  { %v3704_v9 = vld [vmem:[#allocation7 + $0xac] ss:$16 sps:$4 sm:$0xff]   ;;  %v3702_v10 = vld [vmem:[#allocation7 + $0xa8] ss:$16 sps:$4 sm:$0xff]   ;;  %vm4400_vm0 = vmmov 0   ;;  %s4401_s7 = smov [#allocation16]  }
  0xaa   :  { %1242 = vmatpush1.bf16.msra.mxu0 %v3699_v33  ;;  %v3710_v11 = vld [vmem:[#allocation7 + $0xcc] ss:$16 sps:$4 sm:$0xff]   ;;  %v3708_v12 = vld [vmem:[#allocation7 + $0xc8] ss:$16 sps:$4 sm:$0xff]   ;;  %v3765_v33 = vld [vmem:[#allocation7 + $0x1e0] ss:$16 sps:$4 sm:$0xff]  }
  0xab   :  { %365 = vmatpush1.bf16.msra.mxu1 %v3642_v15  ;;  %1243 = vmatprep.subr.bf16.mxu0 %v3700_v35  ;;  %v3716_v13 = vld [vmem:[#allocation7 + $0xec] ss:$16 sps:$4 sm:$0xff]   ;;  %v3714_v14 = vld [vmem:[#allocation7 + $0xe8] ss:$16 sps:$4 sm:$0xff]   ;;  %v3768_v35 = vld [vmem:[#allocation7 + $0x204] ss:$16 sps:$4 sm:$0xff]  }
  0xac   :  { %366 = vmatprep.subr.bf16.mxu1 %v3643_v16  ;;  %v3722_v15 = vld [vmem:[#allocation7 + $0x10c] ss:$16 sps:$4 sm:$0xff]   ;;  %v3720_v16 = vld [vmem:[#allocation7 + $0x108] ss:$16 sps:$4 sm:$0xff]   ;;  %s3134_s20 = sshll.u32 %s4401_s7, 4  ;;  %s3135_s20 = int_to_ptr.vmem [resolvable:$true] %s3134_s20 }
  0xad   :  { %v3728_v17 = vld [vmem:[#allocation7 + $0x12c] ss:$16 sps:$4 sm:$0xff]   ;;  %v3726_v18 = vld [vmem:[#allocation7 + $0x128] ss:$16 sps:$4 sm:$0xff]   ;;  %s4350_s2 = scalar_lea.vmem %s3135_s20, 128  ;;  %p4355_p9 = scmp.lt.s32.totalorder %s3135_s20, %s3135_s20 }
  0xae   :  { %1244 = vmatpush1.bf16.msra.mxu0 %v3705_v38  ;;  %v3732_v20 = vld [vmem:[#allocation7 + $0x148] ss:$16 sps:$4 sm:$0xff]   ;;  %v3740_v21 = vld [vmem:[#allocation7 + $0x16c] ss:$16 sps:$4 sm:$0xff]   ;;  %p4351_p8 = scmp.ne.s32.totalorder %s3135_s20, %s4350_s2  ;;  %p4356_p10 = scmp.lt.s32.totalorder %s4350_s2, %s4350_s2 }
  0xaf   :  { %367 = vmatpush1.bf16.msra.mxu1 %v3645_v19  ;;  %1245 = vmatprep.subr.bf16.mxu0 %v3706_v39  ;;  %v3734_v19 = vld [vmem:[#allocation7 + $0x14c] ss:$16 sps:$4 sm:$0xff]   ;;  %v3738_v22 = vld [vmem:[#allocation7 + $0x168] ss:$16 sps:$4 sm:$0xff]  }
  0xb0   :  { %393 = vmatprep.subr.bf16.mxu1 %v3648_v23  ;;  %v3746_v23 = vld [vmem:[#allocation7 + $0x18c] ss:$16 sps:$4 sm:$0xff]   ;;  %v3756_v30 = vld [vmem:[#allocation7 + $0x1c8] ss:$16 sps:$4 sm:$0xff]   ;;  %p4357_p11 = por %p4356_p10, %p4355_p9 }
  0xb1   :  { %v3752_v25 = vld [vmem:[#allocation7 + $0x1ac] ss:$16 sps:$4 sm:$0xff]  }
  0xb2   :  { %385 = vmatmul.mubr.bf16.vlgmr.msra.gmra.mrb[0].mxu1 %v4558_v24  ;;  %1246 = vmatpush1.bf16.msra.mxu0 %v3711_v41  ;;  %v3758_v28 = vld [vmem:[#allocation7 + $0x1cc] ss:$16 sps:$4 sm:$0xff]   ;;  %p4358_p12 = pnand %p4357_p11, %p4351_p8 }
  0xb3   :  { %394 = vmatpush1.bf16.msra.mxu1 %v3646_v26  ;;  %425 = vmatprep.mubr.bf16.mxu1 %v4398_v0  ;;  %v3686_v0 = vld [vmem:[#allocation7 + $0x4c] ss:$16 sps:$4 sm:$0xff]   ;;  %v3750_v26 = vld [vmem:[#allocation7 + $0x1a8] ss:$16 sps:$4 sm:$0xff]  }
  0xb4   :  { %395 = vmatprep.subr.bf16.mxu1 %v3651_v27  ;;  %1247 = vmatprep.subr.bf16.mxu0 %v3712_v43  ;;  %v3754_v27 = vld [vmem:[#allocation7 + $0x1c4] ss:$16 sps:$4 sm:$0xff]  }
  0xb6   :  { %1248 = vmatpush1.bf16.msra.mxu0 %v3717_v46 }
  0xb7   :  { %396 = vmatpush1.bf16.msra.mxu1 %v3649_v29  ;;  %1249 = vmatprep.subr.bf16.mxu0 %v3718_v47  ;;  %v3759_v29 = vld [vmem:[#allocation7 + $0x1c0] ss:$16 sps:$4 sm:$0xff]  }
  0xb8   :  { %397 = vmatprep.subr.bf16.mxu1 %v3654_v32  ;;  %v3764_v32 = vld [vmem:[#allocation7 + $0x1ec] ss:$16 sps:$4 sm:$0xff]  }
  0xba   :  { %1250 = vmatpush1.bf16.msra.mxu0 %v3723_v49 }
  0xbb   :  { %398 = vmatpush1.bf16.msra.mxu1 %v3652_v34  ;;  %1251 = vmatprep.subr.bf16.mxu0 %v3724_v51  ;;  %v3762_v34 = vld [vmem:[#allocation7 + $0x1e8] ss:$16 sps:$4 sm:$0xff]  }
  0xbc   :  { %399 = vmatprep.subr.bf16.mxu1 %v3657_v36  ;;  %v3771_v36 = vld [vmem:[#allocation7 + $0x20c] ss:$16 sps:$4 sm:$0xff]  }
  0xbe   :  { %1252 = vmatpush1.bf16.msra.mxu0 %v3729_v55 }
  0xbf   :  { %400 = vmatpush1.bf16.msra.mxu1 %v3655_v37  ;;  %1253 = vmatprep.subr.bf16.mxu0 %v3730_v56  ;;  %v172_v37 = vlaneseq  ;;  %v3774_v56 = vld [vmem:[#allocation7 + $0x224] ss:$16 sps:$4 sm:$0xff]  }
  0xc0   :  { %401 = vmatprep.subr.bf16.mxu1 %v3660_v40  ;;  %v4567_v40 = vld [vmem:[#allocation14] ss:$8 sm:$0xf] }
  0xc1   :  { %v4562_v38 = vshrl.u32 %v172_v37, 7  ;;  %v3828_v37 = vld [vmem:[#allocation7 + $0x344] ss:$16 sps:$4 sm:$0xff]  }
  0xc2   :  { %1254 = vmatpush1.bf16.msra.mxu0 %v3735_v57  ;;  %v3777_v57 = vld [vmem:[#allocation7 + $0x22c] ss:$16 sps:$4 sm:$0xff]  }
  0xc3   :  { %402 = vmatpush1.bf16.msra.mxu1 %v3658_v42  ;;  %1255 = vmatprep.subr.bf16.mxu0 %v3736_v59  ;;  %v4565_v39 = vsub.s32 0, %v4562_v38  ;;  %v4570_v41 = vsub.s32 1, %v4562_v38  ;;  %v3775_v59 = vld [vmem:[#allocation7 + $0x228] ss:$16 sps:$4 sm:$0xff]  }
  0xc4   :  { %403 = vmatprep.subr.bf16.mxu1 %v3663_v44 }
  0xc5   :  { %v175_v42 = vrot.slane %v4567_v40, %v4565_v39  ;;  %v179_v43 = vrot.slane %v4567_v40, %v4570_v41 }
  0xc6   :  { %1256 = vmatpush1.bf16.msra.mxu0 %v3741_v61  ;;  %v3783_v61 = vld [vmem:[#allocation7 + $0x24c] ss:$16 sps:$4 sm:$0xff]  }
  0xc7   :  { %404 = vmatpush1.bf16.msra.mxu1 %v3661_v45  ;;  %1257 = vmatprep.subr.bf16.mxu0 %v3742_v63  ;;  %v3781_v63 = vld [vmem:[#allocation7 + $0x248] ss:$16 sps:$4 sm:$0xff]  }
  0xc8   :  { %405 = vmatprep.subr.bf16.mxu1 %v3666_v48 }
  0xca   :  { %1258 = vmatpush1.bf16.msra.mxu0 %v3747_v1  ;;  %v3789_v1 = vld [vmem:[#allocation7 + $0x26c] ss:$16 sps:$4 sm:$0xff]  }
  0xcb   :  { %406 = vmatpush1.bf16.msra.mxu1 %v3664_v50  ;;  %1259 = vmatprep.subr.bf16.mxu0 %v3748_v3  ;;  %v3787_v3 = vld [vmem:[#allocation7 + $0x268] ss:$16 sps:$4 sm:$0xff]  }
  0xcc   :  { %407 = vmatprep.subr.bf16.mxu1 %v3669_v52 }
  0xce   :  { %1260 = vmatpush1.bf16.msra.mxu0 %v3753_v5  ;;  %v3795_v5 = vld [vmem:[#allocation7 + $0x28c] ss:$16 sps:$4 sm:$0xff]  }
  0xcf   :  { %408 = vmatpush1.bf16.msra.mxu1 %v3667_v53  ;;  %1261 = vmatprep.subr.bf16.mxu0 %v3754_v27  ;;  %v3766_v53 = vld [vmem:[#allocation7 + $0x200] ss:$16 sps:$4 sm:$0xff]   ;;  %v3819_v27 = vld [vmem:[#allocation7 + $0x30c] ss:$16 sps:$4 sm:$0xff]  }
  0xd0   :  { %1315 = vmatprep.subr.bf16.mxu1 %v3674_v54  ;;  %v3769_v54 = vld [vmem:[#allocation7 + $0x208] ss:$16 sps:$4 sm:$0xff]  }
  0xd2   :  { %426 = vmatmul.mubr.bf16.vlgmr.msra.gmra.mrb[4].mxu1 %v4558_v24  ;;  %v3744_v24 = vld [vmem:[#allocation7 + $0x188] ss:$16 sps:$4 sm:$0xff]   ;;  %1262 = vmatpush1.bf16.msra.mxu0 %v3759_v29 }
  0xd3   :  { %1316 = vmatpush1.bf16.msra.mxu1 %v3672_v58  ;;  %1263 = vmatprep.subr.bf16.mxu0 %v3760_v31  ;;  %v3772_v58 = vld [vmem:[#allocation7 + $0x220] ss:$16 sps:$4 sm:$0xff]   ;;  %v3817_v31 = vld [vmem:[#allocation7 + $0x308] ss:$16 sps:$4 sm:$0xff]  }
  0xd4   :  { %1317 = vmatprep.subr.bf16.mxu1 %v3680_v60  ;;  %v3780_v60 = vld [vmem:[#allocation7 + $0x244] ss:$16 sps:$4 sm:$0xff]  }
  0xd6   :  { %1264 = vmatpush1.bf16.msra.mxu0 %v3765_v33  ;;  %v3822_v33 = vld [vmem:[#allocation7 + $0x324] ss:$16 sps:$4 sm:$0xff]  }
  0xd7   :  { %1318 = vmatpush1.bf16.msra.mxu1 %v3678_v62  ;;  %1274 = vmatprep.subr.bf16.mxu0 %v3768_v35  ;;  %v3778_v62 = vld [vmem:[#allocation7 + $0x240] ss:$16 sps:$4 sm:$0xff]  }
  0xd8   :  { %1319 = vmatprep.subr.bf16.mxu1 %v3686_v0  ;;  %v3786_v0 = vld [vmem:[#allocation7 + $0x264] ss:$16 sps:$4 sm:$0xff]   ;;  %v3820_v35 = vld [vmem:[#allocation7 + $0x320] ss:$16 sps:$4 sm:$0xff]  }
  0xdb   :  { %1320 = vmatpush1.bf16.msra.mxu1 %v3684_v2  ;;  %v3784_v2 = vld [vmem:[#allocation7 + $0x260] ss:$16 sps:$4 sm:$0xff]  }
  0xdc   :  { %1321 = vmatprep.subr.bf16.mxu1 %v3692_v4  ;;  %v3792_v4 = vld [vmem:[#allocation7 + $0x284] ss:$16 sps:$4 sm:$0xff]  }
  0xdf   :  { %1322 = vmatpush1.bf16.msra.mxu1 %v3690_v6  ;;  %v3790_v6 = vld [vmem:[#allocation7 + $0x280] ss:$16 sps:$4 sm:$0xff]  }
  0xe0   :  { %1323 = vmatprep.subr.bf16.mxu1 %v3698_v7  ;;  %v3793_v7 = vld [vmem:[#allocation7 + $0x288] ss:$16 sps:$4 sm:$0xff]  }
  0xe3   :  { %1324 = vmatpush1.bf16.msra.mxu1 %v3696_v8  ;;  %v3798_v8 = vld [vmem:[#allocation7 + $0x2a4] ss:$16 sps:$4 sm:$0xff]  }
  0xe4   :  { %1325 = vmatprep.subr.bf16.mxu1 %v3704_v9  ;;  %v3801_v9 = vld [vmem:[#allocation7 + $0x2ac] ss:$16 sps:$4 sm:$0xff]  }
  0xe7   :  { %1326 = vmatpush1.bf16.msra.mxu1 %v3702_v10  ;;  %v3796_v10 = vld [vmem:[#allocation7 + $0x2a0] ss:$16 sps:$4 sm:$0xff]  }
  0xe8   :  { %1327 = vmatprep.subr.bf16.mxu1 %v3710_v11  ;;  %v3799_v11 = vld [vmem:[#allocation7 + $0x2a8] ss:$16 sps:$4 sm:$0xff]  }
  0xeb   :  { %1328 = vmatpush1.bf16.msra.mxu1 %v3708_v12  ;;  %v4577_v12 = vsub.s32 3, %v4562_v38 }
  0xec   :  { %1329 = vmatprep.subr.bf16.mxu1 %v3716_v13  ;;  %v3804_v13 = vld [vmem:[#allocation7 + $0x2c4] ss:$16 sps:$4 sm:$0xff]  }
  0xef   :  { %1330 = vmatpush1.bf16.msra.mxu1 %v3714_v14  ;;  %v3807_v14 = vld [vmem:[#allocation7 + $0x2cc] ss:$16 sps:$4 sm:$0xff]  }
  0xf0   :  { %1331 = vmatprep.subr.bf16.mxu1 %v3722_v15  ;;  %v3802_v15 = vld [vmem:[#allocation7 + $0x2c0] ss:$16 sps:$4 sm:$0xff]  }
  0xf3   :  { %1332 = vmatpush1.bf16.msra.mxu1 %v3720_v16  ;;  %v3805_v16 = vld [vmem:[#allocation7 + $0x2c8] ss:$16 sps:$4 sm:$0xff]  }
  0xf4   :  { %1333 = vmatprep.subr.bf16.mxu1 %v3728_v17  ;;  %v187_v17 = vrot.slane %v4567_v40, %v4577_v12 }
  0xf7   :  { %1334 = vmatpush1.bf16.msra.mxu1 %v3726_v18  ;;  %v3810_v18 = vld [vmem:[#allocation7 + $0x2e4] ss:$16 sps:$4 sm:$0xff]  }
  0xf8   :  { %1335 = vmatprep.subr.bf16.mxu1 %v3734_v19  ;;  %v3813_v19 = vld [vmem:[#allocation7 + $0x2ec] ss:$16 sps:$4 sm:$0xff]  }
  0xfb   :  { %1336 = vmatpush1.bf16.msra.mxu1 %v3732_v20 }
  0xfc   :  { %1337 = vmatprep.subr.bf16.mxu1 %v3740_v21 }
  0xff   :  { %1338 = vmatpush1.bf16.msra.mxu1 %v3738_v22  ;;  %v3808_v22 = vld [vmem:[#allocation7 + $0x2e0] ss:$16 sps:$4 sm:$0xff]  }
 0x100   :  { %1339 = vmatprep.subr.bf16.mxu1 %v3746_v23  ;;  %v3811_v23 = vld [vmem:[#allocation7 + $0x2e8] ss:$16 sps:$4 sm:$0xff]  }
 0x103   :  { %1340 = vmatpush1.bf16.msra.mxu1 %v3744_v24 }
 0x104   :  { %1341 = vmatprep.subr.bf16.mxu1 %v3752_v25 }
 0x107   :  { %1342 = vmatpush1.bf16.msra.mxu1 %v3750_v26  ;;  %v3816_v26 = vld [vmem:[#allocation7 + $0x304] ss:$16 sps:$4 sm:$0xff]  }
 0x108   :  { %1343 = vmatprep.subr.bf16.mxu1 %v3758_v28 }
 0x10b   :  { %1344 = vmatpush1.bf16.msra.mxu1 %v3756_v30  ;;  %v3814_v30 = vld [vmem:[#allocation7 + $0x300] ss:$16 sps:$4 sm:$0xff]  }
 0x10c   :  { %1345 = vmatprep.subr.bf16.mxu1 %v3764_v32 }
 0x10f   :  { %1346 = vmatpush1.bf16.msra.mxu1 %v3762_v34  ;;  %v3825_v34 = vld [vmem:[#allocation7 + $0x32c] ss:$16 sps:$4 sm:$0xff]  }
 0x110   :  { %1356 = vmatprep.subr.bf16.mxu1 %v3771_v36  ;;  %v3823_v36 = vld [vmem:[#allocation7 + $0x328] ss:$16 sps:$4 sm:$0xff]  }
 0x185   :  { %v386_v44 = vpop.f32.mrb[0].mxu1 }
 0x186   :  { %v387_v45 = vadd.f32 %v386_v44, %v175_v42  ;;  %v388_v46 = vpop.f32.mrb[1].mxu1  ;;  %v3831_v42 = vld [vmem:[#allocation7 + $0x34c] ss:$16 sps:$4 sm:$0xff]   ;;  %v3829_v44 = vld [vmem:[#allocation7 + $0x348] ss:$16 sps:$4 sm:$0xff]  }
 0x187   :  { %v389_v47 = vadd.f32 %v388_v46, %v179_v43  ;;  %v390_v48 = vpop.f32.mrb[2].mxu1  ;;  %v3826_v43 = vld [vmem:[#allocation7 + $0x340] ss:$16 sps:$4 sm:$0xff]   ;;  %v3837_v46 = vld [vmem:[#allocation7 + $0x36c] ss:$16 sps:$4 sm:$0xff]  }
 0x188   :  { %v434_v49 = vmax.f32 %v387_v45, 0.0  ;;  %v391_v50 = vpop.f32.mrb[3].mxu1  ;;  %v3834_v45 = vld [vmem:[#allocation7 + $0x364] ss:$16 sps:$4 sm:$0xff]   ;;  %v3835_v48 = vld [vmem:[#allocation7 + $0x368] ss:$16 sps:$4 sm:$0xff]  }
 0x189   :  { %v435_v51 = vmax.f32 %v389_v47, 0.0  ;;  %v3832_v47 = vld [vmem:[#allocation7 + $0x360] ss:$16 sps:$4 sm:$0xff]   ;;  %v3843_v50 = vld [vmem:[#allocation7 + $0x38c] ss:$16 sps:$4 sm:$0xff]  }
 0x18a   :  { %v440_v55 = vpack.c.bf16 %v434_v49, %v434_v49  ;;  %v3840_v49 = vld [vmem:[#allocation7 + $0x384] ss:$16 sps:$4 sm:$0xff]  }
 0x18b   :  { %v441_v52 = vpack.c.bf16 %v435_v51, %v435_v51  ;;  %v3838_v51 = vld [vmem:[#allocation7 + $0x380] ss:$16 sps:$4 sm:$0xff]  }
 0x18d   :  { %1265 = vmatprep.mubr.bf16.mxu0 %v441_v52  ;;  %1347 = vmatprep.mubr.bf16.mxu1 %v441_v52  ;;  %v3841_v52 = vld [vmem:[#allocation7 + $0x388] ss:$16 sps:$4 sm:$0xff]  }
 0x18e   :  { %1266 = vmatmul.mubr.bf16.vlgmr.msra.gmra.mrb[0].mxu0 %v440_v55  ;;  %1348 = vmatmul.mubr.bf16.vlgmr.msra.gmra.mrb[8].mxu1 %v440_v55  ;;  %v3849_v55 = vld [vmem:[#allocation7 + $0x3ac] ss:$16 sps:$4 sm:$0xff]  }
 0x18f   :  { %1275 = vmatpush1.bf16.msra.mxu0 %v3766_v53  ;;  %1357 = vmatpush1.bf16.msra.mxu1 %v3769_v54  ;;  %v4584_v53 = vsub.s32 2, %v4562_v38  ;;  %v3846_v54 = vld [vmem:[#allocation7 + $0x3a4] ss:$16 sps:$4 sm:$0xff]  }
 0x190   :  { %1276 = vmatprep.subr.bf16.mxu0 %v3774_v56  ;;  %1358 = vmatprep.subr.bf16.mxu1 %v3777_v57  ;;  %v3844_v56 = vld [vmem:[#allocation7 + $0x3a0] ss:$16 sps:$4 sm:$0xff]   ;;  %v3847_v57 = vld [vmem:[#allocation7 + $0x3a8] ss:$16 sps:$4 sm:$0xff]  }
 0x193   :  { %1277 = vmatpush1.bf16.msra.mxu0 %v3772_v58  ;;  %1359 = vmatpush1.bf16.msra.mxu1 %v3775_v59  ;;  %v183_v58 = vrot.slane %v4567_v40, %v4584_v53  ;;  %v3852_v59 = vld [vmem:[#allocation7 + $0x3c4] ss:$16 sps:$4 sm:$0xff]  }
 0x194   :  { %1278 = vmatprep.subr.bf16.mxu0 %v3780_v60  ;;  %1360 = vmatprep.subr.bf16.mxu1 %v3783_v61  ;;  %v3855_v60 = vld [vmem:[#allocation7 + $0x3cc] ss:$16 sps:$4 sm:$0xff]   ;;  %v3850_v61 = vld [vmem:[#allocation7 + $0x3c0] ss:$16 sps:$4 sm:$0xff]   ;;  %v3864_v40 = vld [vmem:[#allocation8 + $0x4] ss:$16 sps:$4 sm:$0xff]  }
 0x197   :  { %1279 = vmatpush1.bf16.msra.mxu0 %v3778_v62  ;;  %1361 = vmatpush1.bf16.msra.mxu1 %v3781_v63  ;;  %v3853_v62 = vld [vmem:[#allocation7 + $0x3c8] ss:$16 sps:$4 sm:$0xff]   ;;  %v3858_v63 = vld [vmem:[#allocation7 + $0x3e4] ss:$16 sps:$4 sm:$0xff]  }
 0x198   :  { %1280 = vmatprep.subr.bf16.mxu0 %v3786_v0  ;;  %1362 = vmatprep.subr.bf16.mxu1 %v3789_v1  ;;  %v3861_v0 = vld [vmem:[#allocation7 + $0x3ec] ss:$16 sps:$4 sm:$0xff]   ;;  %v3856_v1 = vld [vmem:[#allocation7 + $0x3e0] ss:$16 sps:$4 sm:$0xff]  }
 0x19b   :  { %1281 = vmatpush1.bf16.msra.mxu0 %v3784_v2  ;;  %1363 = vmatpush1.bf16.msra.mxu1 %v3787_v3  ;;  %v3859_v2 = vld [vmem:[#allocation7 + $0x3e8] ss:$16 sps:$4 sm:$0xff]  }
 0x19c   :  { %1282 = vmatprep.subr.bf16.mxu0 %v3792_v4  ;;  %1364 = vmatprep.subr.bf16.mxu1 %v3795_v5  ;;  %v3867_v4 = vld [vmem:[#allocation8 + $0xc] ss:$16 sps:$4 sm:$0xff]   ;;  %v3862_v5 = vld [vmem:[#allocation8] ss:$16 sps:$4 sm:$0xff]  }
 0x19f   :  { %1283 = vmatpush1.bf16.msra.mxu0 %v3790_v6  ;;  %1365 = vmatpush1.bf16.msra.mxu1 %v3793_v7  ;;  %v3865_v6 = vld [vmem:[#allocation8 + $0x8] ss:$16 sps:$4 sm:$0xff]  }
 0x1a0   :  { %1284 = vmatprep.subr.bf16.mxu0 %v3798_v8  ;;  %1366 = vmatprep.subr.bf16.mxu1 %v3801_v9  ;;  %v3870_v8 = vld [vmem:[#allocation8 + $0x24] ss:$16 sps:$4 sm:$0xff]   ;;  %v3873_v9 = vld [vmem:[#allocation8 + $0x2c] ss:$16 sps:$4 sm:$0xff]  }
 0x1a3   :  { %1285 = vmatpush1.bf16.msra.mxu0 %v3796_v10  ;;  %1367 = vmatpush1.bf16.msra.mxu1 %v3799_v11  ;;  %v3868_v10 = vld [vmem:[#allocation8 + $0x20] ss:$16 sps:$4 sm:$0xff]   ;;  %v3871_v11 = vld [vmem:[#allocation8 + $0x28] ss:$16 sps:$4 sm:$0xff]  }
 0x1a4   :  { %1286 = vmatprep.subr.bf16.mxu0 %v3804_v13  ;;  %1368 = vmatprep.subr.bf16.mxu1 %v3807_v14  ;;  %v3876_v13 = vld [vmem:[#allocation8 + $0x44] ss:$16 sps:$4 sm:$0xff]   ;;  %v3879_v14 = vld [vmem:[#allocation8 + $0x4c] ss:$16 sps:$4 sm:$0xff]  }
 0x1a5   :  { %v4581_v20 = vpop.f32.mrb[4].mxu1 }
 0x1a6   :  { %v429_v21 = vpop.f32.mrb[5].mxu1  ;;  %v428_v38 = vadd.f32 %v4581_v20, %v183_v58  ;;  %v3883_v20 = vld [vmem:[#allocation8 + $0x68] ss:$16 sps:$4 sm:$0xff]   ;;  %v3936_v58 = vld [vmem:[#allocation8 + $0x184] ss:$16 sps:$4 sm:$0xff]  }
 0x1a7   :  { %1287 = vmatpush1.bf16.msra.mxu0 %v3802_v15  ;;  %1369 = vmatpush1.bf16.msra.mxu1 %v3805_v16  ;;  %v430_v24 = vadd.f32 %v429_v21, %v187_v17  ;;  %v431_v25 = vpop.f32.mrb[6].mxu1  ;;  %v3874_v15 = vld [vmem:[#allocation8 + $0x40] ss:$16 sps:$4 sm:$0xff]   ;;  %v3877_v16 = vld [vmem:[#allocation8 + $0x48] ss:$16 sps:$4 sm:$0xff]  }
 0x1a8   :  { %1288 = vmatprep.subr.bf16.mxu0 %v3810_v18  ;;  %1370 = vmatprep.subr.bf16.mxu1 %v3813_v19  ;;  %v432_v28 = vpop.f32.mrb[7].mxu1  ;;  %v436_v3 = vmax.f32 %v428_v38, 0.0  ;;  %v3882_v17 = vld [vmem:[#allocation8 + $0x64] ss:$16 sps:$4 sm:$0xff]   ;;  %v3885_v18 = vld [vmem:[#allocation8 + $0x6c] ss:$16 sps:$4 sm:$0xff]  }
 0x1a9   :  { %v437_v29 = vmax.f32 %v430_v24, 0.0  ;;  %v3880_v19 = vld [vmem:[#allocation8 + $0x60] ss:$16 sps:$4 sm:$0xff]   ;;  %v3888_v21 = vld [vmem:[#allocation8 + $0x84] ss:$16 sps:$4 sm:$0xff]  }
 0x1aa   :  { %v442_v7 = vpack.c.bf16 %v436_v3, %v436_v3  ;;  %v3889_v24 = vld [vmem:[#allocation8 + $0x88] ss:$16 sps:$4 sm:$0xff]   ;;  %v3894_v25 = vld [vmem:[#allocation8 + $0xa4] ss:$16 sps:$4 sm:$0xff]   ;;  %v3945_v38 = vld [vmem:[#allocation8 + $0x1ac] ss:$16 sps:$4 sm:$0xff]  }
 0x1ab   :  { %1289 = vmatpush1.bf16.msra.mxu0 %v3808_v22  ;;  %1371 = vmatpush1.bf16.msra.mxu1 %v3811_v23  ;;  %v443_v32 = vpack.c.bf16 %v437_v29, %v437_v29  ;;  %v3891_v22 = vld [vmem:[#allocation8 + $0x8c] ss:$16 sps:$4 sm:$0xff]   ;;  %v3886_v23 = vld [vmem:[#allocation8 + $0x80] ss:$16 sps:$4 sm:$0xff]   ;;  %v3895_v28 = vld [vmem:[#allocation8 + $0xa8] ss:$16 sps:$4 sm:$0xff]  }
 0x1ac   :  { %1290 = vmatprep.subr.bf16.mxu0 %v3816_v26  ;;  %1372 = vmatprep.subr.bf16.mxu1 %v3819_v27  ;;  %v3897_v26 = vld [vmem:[#allocation8 + $0xac] ss:$16 sps:$4 sm:$0xff]   ;;  %v3892_v27 = vld [vmem:[#allocation8 + $0xa0] ss:$16 sps:$4 sm:$0xff]   ;;  %v3900_v29 = vld [vmem:[#allocation8 + $0xc4] ss:$16 sps:$4 sm:$0xff]  }
 0x1ad   :  { %1306 = vmatprep.mubr.bf16.mxu0 %v443_v32  ;;  %1388 = vmatprep.mubr.bf16.mxu1 %v443_v32  ;;  %v3901_v32 = vld [vmem:[#allocation8 + $0xc8] ss:$16 sps:$4 sm:$0xff]   ;;  %v3946_v3 = vld [vmem:[#allocation8 + $0x1c0] ss:$16 sps:$4 sm:$0xff]  }
 0x1af   :  { %1291 = vmatpush1.bf16.msra.mxu0 %v3814_v30  ;;  %1373 = vmatpush1.bf16.msra.mxu1 %v3817_v31  ;;  %v3903_v30 = vld [vmem:[#allocation8 + $0xcc] ss:$16 sps:$4 sm:$0xff]   ;;  %v3898_v31 = vld [vmem:[#allocation8 + $0xc0] ss:$16 sps:$4 sm:$0xff]  }
 0x1b0   :  { %1292 = vmatprep.subr.bf16.mxu0 %v3822_v33  ;;  %1374 = vmatprep.subr.bf16.mxu1 %v3825_v34  ;;  %v3906_v33 = vld [vmem:[#allocation8 + $0xe4] ss:$16 sps:$4 sm:$0xff]   ;;  %v3909_v34 = vld [vmem:[#allocation8 + $0xec] ss:$16 sps:$4 sm:$0xff]  }
 0x1b3   :  { %1293 = vmatpush1.bf16.msra.mxu0 %v3820_v35  ;;  %1375 = vmatpush1.bf16.msra.mxu1 %v3823_v36  ;;  %v3904_v35 = vld [vmem:[#allocation8 + $0xe0] ss:$16 sps:$4 sm:$0xff]   ;;  %v3907_v36 = vld [vmem:[#allocation8 + $0xe8] ss:$16 sps:$4 sm:$0xff]  }
 0x1b4   :  { %1294 = vmatprep.subr.bf16.mxu0 %v3828_v37  ;;  %1376 = vmatprep.subr.bf16.mxu1 %v3831_v42  ;;  %v3912_v37 = vld [vmem:[#allocation8 + $0x104] ss:$16 sps:$4 sm:$0xff]   ;;  %v3915_v42 = vld [vmem:[#allocation8 + $0x10c] ss:$16 sps:$4 sm:$0xff]  }
 0x1b7   :  { %1295 = vmatpush1.bf16.msra.mxu0 %v3826_v43  ;;  %1377 = vmatpush1.bf16.msra.mxu1 %v3829_v44  ;;  %v3910_v43 = vld [vmem:[#allocation8 + $0x100] ss:$16 sps:$4 sm:$0xff]   ;;  %v3913_v44 = vld [vmem:[#allocation8 + $0x108] ss:$16 sps:$4 sm:$0xff]  }
 0x1b8   :  { %1296 = vmatprep.subr.bf16.mxu0 %v3834_v45  ;;  %1378 = vmatprep.subr.bf16.mxu1 %v3837_v46  ;;  %v3918_v45 = vld [vmem:[#allocation8 + $0x124] ss:$16 sps:$4 sm:$0xff]   ;;  %v3921_v46 = vld [vmem:[#allocation8 + $0x12c] ss:$16 sps:$4 sm:$0xff]  }
 0x1bb   :  { %1297 = vmatpush1.bf16.msra.mxu0 %v3832_v47  ;;  %1379 = vmatpush1.bf16.msra.mxu1 %v3835_v48  ;;  %v3916_v47 = vld [vmem:[#allocation8 + $0x120] ss:$16 sps:$4 sm:$0xff]   ;;  %v3919_v48 = vld [vmem:[#allocation8 + $0x128] ss:$16 sps:$4 sm:$0xff]  }
 0x1bc   :  { %1298 = vmatprep.subr.bf16.mxu0 %v3840_v49  ;;  %1380 = vmatprep.subr.bf16.mxu1 %v3843_v50  ;;  %v3924_v49 = vld [vmem:[#allocation8 + $0x144] ss:$16 sps:$4 sm:$0xff]   ;;  %v3927_v50 = vld [vmem:[#allocation8 + $0x14c] ss:$16 sps:$4 sm:$0xff]  }
 0x1bf   :  { %1299 = vmatpush1.bf16.msra.mxu0 %v3838_v51  ;;  %1381 = vmatpush1.bf16.msra.mxu1 %v3841_v52  ;;  %v3922_v51 = vld [vmem:[#allocation8 + $0x140] ss:$16 sps:$4 sm:$0xff]   ;;  %v3925_v52 = vld [vmem:[#allocation8 + $0x148] ss:$16 sps:$4 sm:$0xff]  }
 0x1c0   :  { %1300 = vmatprep.subr.bf16.mxu0 %v3846_v54  ;;  %1382 = vmatprep.subr.bf16.mxu1 %v3849_v55  ;;  %v3930_v54 = vld [vmem:[#allocation8 + $0x164] ss:$16 sps:$4 sm:$0xff]   ;;  %v3933_v55 = vld [vmem:[#allocation8 + $0x16c] ss:$16 sps:$4 sm:$0xff]  }
 0x1c3   :  { %1301 = vmatpush1.bf16.msra.mxu0 %v3844_v56  ;;  %1383 = vmatpush1.bf16.msra.mxu1 %v3847_v57  ;;  %v3928_v56 = vld [vmem:[#allocation8 + $0x160] ss:$16 sps:$4 sm:$0xff]   ;;  %v3931_v57 = vld [vmem:[#allocation8 + $0x168] ss:$16 sps:$4 sm:$0xff]  }
 0x1c4   :  { %1302 = vmatprep.subr.bf16.mxu0 %v3852_v59  ;;  %1384 = vmatprep.subr.bf16.mxu1 %v3855_v60  ;;  %v3939_v59 = vld [vmem:[#allocation8 + $0x18c] ss:$16 sps:$4 sm:$0xff]   ;;  %v3934_v60 = vld [vmem:[#allocation8 + $0x180] ss:$16 sps:$4 sm:$0xff]  }
 0x1c7   :  { %1303 = vmatpush1.bf16.msra.mxu0 %v3850_v61  ;;  %1385 = vmatpush1.bf16.msra.mxu1 %v3853_v62  ;;  %v3937_v61 = vld [vmem:[#allocation8 + $0x188] ss:$16 sps:$4 sm:$0xff]   ;;  %v3942_v62 = vld [vmem:[#allocation8 + $0x1a4] ss:$16 sps:$4 sm:$0xff]  }
 0x1c8   :  { %1304 = vmatprep.subr.bf16.mxu0 %v3858_v63  ;;  %1386 = vmatprep.subr.bf16.mxu1 %v3861_v0  ;;  %v3940_v63 = vld [vmem:[#allocation8 + $0x1a0] ss:$16 sps:$4 sm:$0xff]   ;;  %v3943_v0 = vld [vmem:[#allocation8 + $0x1a8] ss:$16 sps:$4 sm:$0xff]  }
 0x1cb   :  { %1305 = vmatpush1.bf16.msra.mxu0 %v3856_v1  ;;  %1387 = vmatpush1.bf16.msra.mxu1 %v3859_v2  ;;  %v3948_v1 = vld [vmem:[#allocation8 + $0x1c4] ss:$16 sps:$4 sm:$0xff]   ;;  %v3951_v2 = vld [vmem:[#allocation8 + $0x1cc] ss:$16 sps:$4 sm:$0xff]  }
 0x1cc   :  { %2196 = vmatprep.subr.bf16.mxu0 %v3864_v40  ;;  %2278 = vmatprep.subr.bf16.mxu1 %v3867_v4  ;;  %v3949_v40 = vld [vmem:[#allocation8 + $0x1c8] ss:$16 sps:$4 sm:$0xff]   ;;  %v3954_v4 = vld [vmem:[#allocation8 + $0x1e4] ss:$16 sps:$4 sm:$0xff]  }
 0x1ce   :  { %1307 = vmatmul.mubr.bf16.vlgmr.msra.gmra.mrb[0].mxu0 %v442_v7  ;;  %1389 = vmatmul.mubr.bf16.vlgmr.msra.gmra.mrb[8].mxu1 %v442_v7  ;;  %v3955_v7 = vld [vmem:[#allocation8 + $0x1e8] ss:$16 sps:$4 sm:$0xff]  }
 0x1cf   :  { %2197 = vmatpush1.bf16.msra.mxu0 %v3862_v5  ;;  %2279 = vmatpush1.bf16.msra.mxu1 %v3865_v6  ;;  %v3957_v5 = vld [vmem:[#allocation8 + $0x1ec] ss:$16 sps:$4 sm:$0xff]   ;;  %v3952_v6 = vld [vmem:[#allocation8 + $0x1e0] ss:$16 sps:$4 sm:$0xff]  }
 0x1d0   :  { %2198 = vmatprep.subr.bf16.mxu0 %v3870_v8  ;;  %2280 = vmatprep.subr.bf16.mxu1 %v3873_v9  ;;  %v3960_v8 = vld [vmem:[#allocation8 + $0x204] ss:$16 sps:$4 sm:$0xff]   ;;  %v3963_v9 = vld [vmem:[#allocation8 + $0x20c] ss:$16 sps:$4 sm:$0xff]  }
 0x1d3   :  { %2199 = vmatpush1.bf16.msra.mxu0 %v3868_v10  ;;  %2281 = vmatpush1.bf16.msra.mxu1 %v3871_v11  ;;  %v4589_v10 = vld [vmem:[#allocation14 + $0x1] ss:$8 sm:$0xf] }
 0x1d4   :  { %2200 = vmatprep.subr.bf16.mxu0 %v3876_v13  ;;  %2282 = vmatprep.subr.bf16.mxu1 %v3879_v14  ;;  %v576_v11 = vrot.slane %v4589_v10, %v4565_v39  ;;  %v580_v13 = vrot.slane %v4589_v10, %v4570_v41  ;;  %v588_v14 = vrot.slane %v4589_v10, %v4577_v12 }
 0x1d7   :  { %2201 = vmatpush1.bf16.msra.mxu0 %v3874_v15  ;;  %2283 = vmatpush1.bf16.msra.mxu1 %v3877_v16 }
 0x1d8   :  { %2202 = vmatprep.subr.bf16.mxu0 %v3882_v17  ;;  %2284 = vmatprep.subr.bf16.mxu1 %v3885_v18 }
 0x1db   :  { %2203 = vmatpush1.bf16.msra.mxu0 %v3880_v19  ;;  %2285 = vmatpush1.bf16.msra.mxu1 %v3883_v20 }
 0x1dc   :  { %2204 = vmatprep.subr.bf16.mxu0 %v3888_v21  ;;  %2286 = vmatprep.subr.bf16.mxu1 %v3891_v22 }
 0x1df   :  { %2205 = vmatpush1.bf16.msra.mxu0 %v3886_v23  ;;  %2287 = vmatpush1.bf16.msra.mxu1 %v3889_v24 }
 0x1e0   :  { %2206 = vmatprep.subr.bf16.mxu0 %v3894_v25  ;;  %2288 = vmatprep.subr.bf16.mxu1 %v3897_v26 }
 0x1e3   :  { %2207 = vmatpush1.bf16.msra.mxu0 %v3892_v27  ;;  %2289 = vmatpush1.bf16.msra.mxu1 %v3895_v28 }
 0x1e4   :  { %2208 = vmatprep.subr.bf16.mxu0 %v3900_v29  ;;  %2290 = vmatprep.subr.bf16.mxu1 %v3903_v30  ;;  %v3958_v30 = vld [vmem:[#allocation8 + $0x200] ss:$16 sps:$4 sm:$0xff]  }
 0x1e7   :  { %2209 = vmatpush1.bf16.msra.mxu0 %v3898_v31  ;;  %2291 = vmatpush1.bf16.msra.mxu1 %v3901_v32  ;;  %v3961_v31 = vld [vmem:[#allocation8 + $0x208] ss:$16 sps:$4 sm:$0xff]  }
 0x1e8   :  { %2210 = vmatprep.subr.bf16.mxu0 %v3906_v33  ;;  %2292 = vmatprep.subr.bf16.mxu1 %v3909_v34  ;;  %v3966_v33 = vld [vmem:[#allocation8 + $0x224] ss:$16 sps:$4 sm:$0xff]   ;;  %v3969_v34 = vld [vmem:[#allocation8 + $0x22c] ss:$16 sps:$4 sm:$0xff]  }
 0x1eb   :  { %2211 = vmatpush1.bf16.msra.mxu0 %v3904_v35  ;;  %2293 = vmatpush1.bf16.msra.mxu1 %v3907_v36  ;;  %v3964_v36 = vld [vmem:[#allocation8 + $0x220] ss:$16 sps:$4 sm:$0xff]  }
 0x1ec   :  { %2212 = vmatprep.subr.bf16.mxu0 %v3912_v37  ;;  %2294 = vmatprep.subr.bf16.mxu1 %v3915_v42  ;;  %v3967_v37 = vld [vmem:[#allocation8 + $0x228] ss:$16 sps:$4 sm:$0xff]   ;;  %v3972_v42 = vld [vmem:[#allocation8 + $0x244] ss:$16 sps:$4 sm:$0xff]  }
 0x1ef   :  { %2213 = vmatpush1.bf16.msra.mxu0 %v3910_v43  ;;  %2295 = vmatpush1.bf16.msra.mxu1 %v3913_v44  ;;  %v3975_v43 = vld [vmem:[#allocation8 + $0x24c] ss:$16 sps:$4 sm:$0xff]   ;;  %v3970_v44 = vld [vmem:[#allocation8 + $0x240] ss:$16 sps:$4 sm:$0xff]  }
 0x1f0   :  { %2214 = vmatprep.subr.bf16.mxu0 %v3918_v45  ;;  %2296 = vmatprep.subr.bf16.mxu1 %v3921_v46  ;;  %v3973_v45 = vld [vmem:[#allocation8 + $0x248] ss:$16 sps:$4 sm:$0xff]   ;;  %v3978_v46 = vld [vmem:[#allocation8 + $0x264] ss:$16 sps:$4 sm:$0xff]  }
 0x1f3   :  { %2215 = vmatpush1.bf16.msra.mxu0 %v3916_v47  ;;  %2297 = vmatpush1.bf16.msra.mxu1 %v3919_v48  ;;  %v3981_v47 = vld [vmem:[#allocation8 + $0x26c] ss:$16 sps:$4 sm:$0xff]   ;;  %v3976_v48 = vld [vmem:[#allocation8 + $0x260] ss:$16 sps:$4 sm:$0xff]  }
 0x1f4   :  { %2216 = vmatprep.subr.bf16.mxu0 %v3924_v49  ;;  %2298 = vmatprep.subr.bf16.mxu1 %v3927_v50  ;;  %v3979_v49 = vld [vmem:[#allocation8 + $0x268] ss:$16 sps:$4 sm:$0xff]   ;;  %v3984_v50 = vld [vmem:[#allocation8 + $0x284] ss:$16 sps:$4 sm:$0xff]  }
 0x1f7   :  { %2217 = vmatpush1.bf16.msra.mxu0 %v3922_v51  ;;  %2299 = vmatpush1.bf16.msra.mxu1 %v3925_v52  ;;  %v3987_v51 = vld [vmem:[#allocation8 + $0x28c] ss:$16 sps:$4 sm:$0xff]   ;;  %v3982_v52 = vld [vmem:[#allocation8 + $0x280] ss:$16 sps:$4 sm:$0xff]  }
 0x1f8   :  { %2218 = vmatprep.subr.bf16.mxu0 %v3930_v54  ;;  %2300 = vmatprep.subr.bf16.mxu1 %v3933_v55  ;;  %v3985_v54 = vld [vmem:[#allocation8 + $0x288] ss:$16 sps:$4 sm:$0xff]   ;;  %v3990_v55 = vld [vmem:[#allocation8 + $0x2a4] ss:$16 sps:$4 sm:$0xff]  }
 0x1fb   :  { %2219 = vmatpush1.bf16.msra.mxu0 %v3928_v56  ;;  %2301 = vmatpush1.bf16.msra.mxu1 %v3931_v57  ;;  %v3993_v56 = vld [vmem:[#allocation8 + $0x2ac] ss:$16 sps:$4 sm:$0xff]   ;;  %v3988_v57 = vld [vmem:[#allocation8 + $0x2a0] ss:$16 sps:$4 sm:$0xff]  }
 0x1fc   :  { %2220 = vmatprep.subr.bf16.mxu0 %v3936_v58  ;;  %2302 = vmatprep.subr.bf16.mxu1 %v3939_v59  ;;  %v3991_v58 = vld [vmem:[#allocation8 + $0x2a8] ss:$16 sps:$4 sm:$0xff]   ;;  %v3996_v59 = vld [vmem:[#allocation8 + $0x2c4] ss:$16 sps:$4 sm:$0xff]  }
 0x1ff   :  { %2221 = vmatpush1.bf16.msra.mxu0 %v3934_v60  ;;  %2303 = vmatpush1.bf16.msra.mxu1 %v3937_v61  ;;  %v3999_v60 = vld [vmem:[#allocation8 + $0x2cc] ss:$16 sps:$4 sm:$0xff]   ;;  %v3994_v61 = vld [vmem:[#allocation8 + $0x2c0] ss:$16 sps:$4 sm:$0xff]  }
 0x200   :  { %2222 = vmatprep.subr.bf16.mxu0 %v3942_v62  ;;  %2304 = vmatprep.subr.bf16.mxu1 %v3945_v38  ;;  %v3997_v62 = vld [vmem:[#allocation8 + $0x2c8] ss:$16 sps:$4 sm:$0xff]   ;;  %v4002_v38 = vld [vmem:[#allocation8 + $0x2e4] ss:$16 sps:$4 sm:$0xff]  }
 0x203   :  { %2223 = vmatpush1.bf16.msra.mxu0 %v3940_v63  ;;  %2305 = vmatpush1.bf16.msra.mxu1 %v3943_v0  ;;  %v4005_v63 = vld [vmem:[#allocation8 + $0x2ec] ss:$16 sps:$4 sm:$0xff]   ;;  %v4000_v0 = vld [vmem:[#allocation8 + $0x2e0] ss:$16 sps:$4 sm:$0xff]  }
 0x204   :  { %2224 = vmatprep.subr.bf16.mxu0 %v3948_v1  ;;  %2306 = vmatprep.subr.bf16.mxu1 %v3951_v2  ;;  %v4003_v1 = vld [vmem:[#allocation8 + $0x2e8] ss:$16 sps:$4 sm:$0xff]   ;;  %v4008_v2 = vld [vmem:[#allocation8 + $0x304] ss:$16 sps:$4 sm:$0xff]  }
 0x207   :  { %2225 = vmatpush1.bf16.msra.mxu0 %v3946_v3  ;;  %2307 = vmatpush1.bf16.msra.mxu1 %v3949_v40  ;;  %v4011_v3 = vld [vmem:[#allocation8 + $0x30c] ss:$16 sps:$4 sm:$0xff]   ;;  %v4006_v40 = vld [vmem:[#allocation8 + $0x300] ss:$16 sps:$4 sm:$0xff]  }
 0x208   :  { %2226 = vmatprep.subr.bf16.mxu0 %v3954_v4  ;;  %2308 = vmatprep.subr.bf16.mxu1 %v3957_v5  ;;  %v4009_v4 = vld [vmem:[#allocation8 + $0x308] ss:$16 sps:$4 sm:$0xff]   ;;  %v4014_v5 = vld [vmem:[#allocation8 + $0x324] ss:$16 sps:$4 sm:$0xff]  }
 0x20b   :  { %2227 = vmatpush1.bf16.msra.mxu0 %v3952_v6  ;;  %2309 = vmatpush1.bf16.msra.mxu1 %v3955_v7  ;;  %v4017_v6 = vld [vmem:[#allocation8 + $0x32c] ss:$16 sps:$4 sm:$0xff]   ;;  %v4012_v7 = vld [vmem:[#allocation8 + $0x320] ss:$16 sps:$4 sm:$0xff]  }
 0x20c   :  { %2237 = vmatprep.subr.bf16.mxu0 %v3960_v8  ;;  %2319 = vmatprep.subr.bf16.mxu1 %v3963_v9  ;;  %v4015_v8 = vld [vmem:[#allocation8 + $0x328] ss:$16 sps:$4 sm:$0xff]   ;;  %v4020_v9 = vld [vmem:[#allocation8 + $0x344] ss:$16 sps:$4 sm:$0xff]  }
 0x2a1   :  { %v1308_v15 = vpop.f32.mrb[0].mxu0  ;;  %v4597_v16 = vpop.f32.mrb[8].mxu1 }
 0x2a2   :  { %v3574_v17 = vadd.f32 %v1308_v15, %v576_v11  ;;  %v1310_v18 = vpop.f32.mrb[1].mxu0  ;;  %v1392_v19 = vpop.f32.mrb[9].mxu1  ;;  %v4023_v11 = vld [vmem:[#allocation8 + $0x34c] ss:$16 sps:$4 sm:$0xff]   ;;  %v4026_v15 = vld [vmem:[#allocation8 + $0x364] ss:$16 sps:$4 sm:$0xff]  }
 0x2a3   :  { %v3575_v20 = vadd.f32 %v1310_v18, %v580_v13  ;;  %v3577_v21 = vadd.f32 %v1392_v19, %v588_v14  ;;  %v1312_v22 = vpop.f32.mrb[2].mxu0  ;;  %v1394_v23 = vpop.f32.mrb[10].mxu1  ;;  %v4018_v13 = vld [vmem:[#allocation8 + $0x340] ss:$16 sps:$4 sm:$0xff]   ;;  %v4021_v14 = vld [vmem:[#allocation8 + $0x348] ss:$16 sps:$4 sm:$0xff]  }
 0x2a4   :  { %v1397_v24 = vmax.f32 %v3574_v17, 0.0  ;;  %v1313_v25 = vpop.f32.mrb[3].mxu0  ;;  %v1395_v26 = vpop.f32.mrb[11].mxu1  ;;  %v4029_v17 = vld [vmem:[#allocation8 + $0x36c] ss:$16 sps:$4 sm:$0xff]  }
 0x2a5   :  { %v1398_v27 = vmax.f32 %v3575_v20, 0.0  ;;  %v1400_v28 = vmax.f32 %v3577_v21, 0.0  ;;  %v4024_v18 = vld [vmem:[#allocation8 + $0x360] ss:$16 sps:$4 sm:$0xff]   ;;  %v4027_v19 = vld [vmem:[#allocation8 + $0x368] ss:$16 sps:$4 sm:$0xff]  }
 0x2a6   :  { %v1403_v32 = vpack.c.bf16 %v1397_v24, %v1397_v24  ;;  %v4032_v20 = vld [vmem:[#allocation8 + $0x384] ss:$16 sps:$4 sm:$0xff]   ;;  %v4035_v21 = vld [vmem:[#allocation8 + $0x38c] ss:$16 sps:$4 sm:$0xff]   ;;  %v4030_v22 = vld [vmem:[#allocation8 + $0x380] ss:$16 sps:$4 sm:$0xff]  }
 0x2a7   :  { %v1404_v29 = vpack.c.bf16 %v1398_v27, %v1398_v27  ;;  %v1406_v35 = vpack.c.bf16 %v1400_v28, %v1400_v28  ;;  %v4033_v23 = vld [vmem:[#allocation8 + $0x388] ss:$16 sps:$4 sm:$0xff]   ;;  %v4038_v24 = vld [vmem:[#allocation8 + $0x3a4] ss:$16 sps:$4 sm:$0xff]   ;;  %v4041_v25 = vld [vmem:[#allocation8 + $0x3ac] ss:$16 sps:$4 sm:$0xff]   ;;  %v584_v28 = vrot.slane %v4589_v10, %v4584_v53 }
 0x2a8   :  { %v4036_v26 = vld [vmem:[#allocation8 + $0x3a0] ss:$16 sps:$4 sm:$0xff]   ;;  %v4039_v27 = vld [vmem:[#allocation8 + $0x3a8] ss:$16 sps:$4 sm:$0xff]   ;;  %v4056_v10 = vld [vmem:[#allocation10 + $0x4] ss:$8 sps:$4 sm:$0xff]  }
 0x2a9   :  { %2228 = vmatprep.mubr.bf16.mxu0 %v1404_v29  ;;  %2310 = vmatprep.mubr.bf16.mxu1 %v1404_v29  ;;  %v4044_v29 = vld [vmem:[#allocation8 + $0x3c4] ss:$16 sps:$4 sm:$0xff]  }
 0x2aa   :  { %2229 = vmatmul.mubr.bf16.vlgmr.msra.gmra.mrb[4].mxu0 %v1403_v32  ;;  %2311 = vmatmul.mubr.bf16.vlgmr.msra.gmra.mrb[12].mxu1 %v1403_v32  ;;  %v4045_v32 = vld [vmem:[#allocation8 + $0x3c8] ss:$16 sps:$4 sm:$0xff]  }
 0x2ab   :  { %2238 = vmatpush1.bf16.msra.mxu0 %v3958_v30  ;;  %2320 = vmatpush1.bf16.msra.mxu1 %v3961_v31  ;;  %v4047_v30 = vld [vmem:[#allocation8 + $0x3cc] ss:$16 sps:$4 sm:$0xff]   ;;  %v4042_v31 = vld [vmem:[#allocation8 + $0x3c0] ss:$16 sps:$4 sm:$0xff]  }
 0x2ac   :  { %2269 = vmatprep.mubr.bf16.mxu0 %v1406_v35  ;;  %2351 = vmatprep.mubr.bf16.mxu1 %v1406_v35  ;;  %v4053_v35 = vld [vmem:[#allocation8 + $0x3ec] ss:$16 sps:$4 sm:$0xff]  }
 0x2ad   :  { %2239 = vmatprep.subr.bf16.mxu0 %v3966_v33  ;;  %2321 = vmatprep.subr.bf16.mxu1 %v3969_v34  ;;  %v3576_v33 = vadd.f32 %v4597_v16, %v584_v28  ;;  %v4050_v34 = vld [vmem:[#allocation8 + $0x3e4] ss:$16 sps:$4 sm:$0xff]   ;;  %v4057_v16 = vld [vmem:[#allocation10 + $0x10] ss:$8 sps:$4 sm:$0xff]  }
 0x2af   :  { %2240 = vmatpush1.bf16.msra.mxu0 %v3964_v36  ;;  %2322 = vmatpush1.bf16.msra.mxu1 %v3967_v37  ;;  %v4048_v36 = vld [vmem:[#allocation8 + $0x3e0] ss:$16 sps:$4 sm:$0xff]   ;;  %v4051_v37 = vld [vmem:[#allocation8 + $0x3e8] ss:$16 sps:$4 sm:$0xff]  }
 0x2b0   :  { %2241 = vmatprep.subr.bf16.mxu0 %v3972_v42  ;;  %2323 = vmatprep.subr.bf16.mxu1 %v3975_v43  ;;  %v1399_v42 = vmax.f32 %v3576_v33, 0.0  ;;  %v4054_v43 = vld [vmem:[#allocation10] ss:$8 sps:$4 sm:$0xff]  }
 0x2b3   :  { %2242 = vmatpush1.bf16.msra.mxu0 %v3970_v44  ;;  %2324 = vmatpush1.bf16.msra.mxu1 %v3973_v45  ;;  %v1405_v44 = vpack.c.bf16 %v1399_v42, %v1399_v42  ;;  %v4059_v45 = vld [vmem:[#allocation10 + $0x14] ss:$8 sps:$4 sm:$0xff]  }
 0x2b4   :  { %2243 = vmatprep.subr.bf16.mxu0 %v3978_v46  ;;  %2325 = vmatprep.subr.bf16.mxu1 %v3981_v47  ;;  %v4062_v46 = vld [vmem:[#allocation10 + $0x24] ss:$8 sps:$4 sm:$0xff]   ;;  %v4060_v47 = vld [vmem:[#allocation10 + $0x20] ss:$8 sps:$4 sm:$0xff]  }
 0x2b7   :  { %2244 = vmatpush1.bf16.msra.mxu0 %v3976_v48  ;;  %2326 = vmatpush1.bf16.msra.mxu1 %v3979_v49  ;;  %v4065_v48 = vld [vmem:[#allocation10 + $0x34] ss:$8 sps:$4 sm:$0xff]   ;;  %v4063_v49 = vld [vmem:[#allocation10 + $0x30] ss:$8 sps:$4 sm:$0xff]  }
 0x2b8   :  { %2245 = vmatprep.subr.bf16.mxu0 %v3984_v50  ;;  %2327 = vmatprep.subr.bf16.mxu1 %v3987_v51  ;;  %v4068_v50 = vld [vmem:[#allocation10 + $0x44] ss:$8 sps:$4 sm:$0xff]   ;;  %v4066_v51 = vld [vmem:[#allocation10 + $0x40] ss:$8 sps:$4 sm:$0xff]  }
 0x2bb   :  { %2246 = vmatpush1.bf16.msra.mxu0 %v3982_v52  ;;  %2328 = vmatpush1.bf16.msra.mxu1 %v3985_v54  ;;  %v4071_v52 = vld [vmem:[#allocation10 + $0x54] ss:$8 sps:$4 sm:$0xff]   ;;  %v4069_v54 = vld [vmem:[#allocation10 + $0x50] ss:$8 sps:$4 sm:$0xff]  }
 0x2bc   :  { %2247 = vmatprep.subr.bf16.mxu0 %v3990_v55  ;;  %2329 = vmatprep.subr.bf16.mxu1 %v3993_v56  ;;  %v4074_v55 = vld [vmem:[#allocation10 + $0x64] ss:$8 sps:$4 sm:$0xff]   ;;  %v4072_v56 = vld [vmem:[#allocation10 + $0x60] ss:$8 sps:$4 sm:$0xff]  }
 0x2bf   :  { %2248 = vmatpush1.bf16.msra.mxu0 %v3988_v57  ;;  %2330 = vmatpush1.bf16.msra.mxu1 %v3991_v58  ;;  %v4077_v57 = vld [vmem:[#allocation10 + $0x74] ss:$8 sps:$4 sm:$0xff]   ;;  %v4075_v58 = vld [vmem:[#allocation10 + $0x70] ss:$8 sps:$4 sm:$0xff]  }
 0x2c0   :  { %2249 = vmatprep.subr.bf16.mxu0 %v3996_v59  ;;  %2331 = vmatprep.subr.bf16.mxu1 %v3999_v60  ;;  %v4080_v59 = vld [vmem:[#allocation10 + $0x84] ss:$8 sps:$4 sm:$0xff]   ;;  %v4078_v60 = vld [vmem:[#allocation10 + $0x80] ss:$8 sps:$4 sm:$0xff]  }
 0x2c3   :  { %2250 = vmatpush1.bf16.msra.mxu0 %v3994_v61  ;;  %2332 = vmatpush1.bf16.msra.mxu1 %v3997_v62  ;;  %v4083_v61 = vld [vmem:[#allocation10 + $0x94] ss:$8 sps:$4 sm:$0xff]   ;;  %v4081_v62 = vld [vmem:[#allocation10 + $0x90] ss:$8 sps:$4 sm:$0xff]  }
 0x2c4   :  { %2251 = vmatprep.subr.bf16.mxu0 %v4002_v38  ;;  %2333 = vmatprep.subr.bf16.mxu1 %v4005_v63  ;;  %v4086_v38 = vld [vmem:[#allocation10 + $0xa4] ss:$8 sps:$4 sm:$0xff]   ;;  %v4084_v63 = vld [vmem:[#allocation10 + $0xa0] ss:$8 sps:$4 sm:$0xff]  }
 0x2c7   :  { %2252 = vmatpush1.bf16.msra.mxu0 %v4000_v0  ;;  %2334 = vmatpush1.bf16.msra.mxu1 %v4003_v1  ;;  %v4089_v0 = vld [vmem:[#allocation10 + $0xb4] ss:$8 sps:$4 sm:$0xff]   ;;  %v4087_v1 = vld [vmem:[#allocation10 + $0xb0] ss:$8 sps:$4 sm:$0xff]  }
 0x2c8   :  { %2253 = vmatprep.subr.bf16.mxu0 %v4008_v2  ;;  %2335 = vmatprep.subr.bf16.mxu1 %v4011_v3  ;;  %v4092_v2 = vld [vmem:[#allocation10 + $0xc4] ss:$8 sps:$4 sm:$0xff]   ;;  %v4090_v3 = vld [vmem:[#allocation10 + $0xc0] ss:$8 sps:$4 sm:$0xff]  }
 0x2cb   :  { %2254 = vmatpush1.bf16.msra.mxu0 %v4006_v40  ;;  %2336 = vmatpush1.bf16.msra.mxu1 %v4009_v4  ;;  %v4095_v40 = vld [vmem:[#allocation10 + $0xd4] ss:$8 sps:$4 sm:$0xff]   ;;  %v4093_v4 = vld [vmem:[#allocation10 + $0xd0] ss:$8 sps:$4 sm:$0xff]  }
 0x2cc   :  { %2255 = vmatprep.subr.bf16.mxu0 %v4014_v5  ;;  %2337 = vmatprep.subr.bf16.mxu1 %v4017_v6  ;;  %v4098_v5 = vld [vmem:[#allocation10 + $0xe4] ss:$8 sps:$4 sm:$0xff]   ;;  %v4096_v6 = vld [vmem:[#allocation10 + $0xe0] ss:$8 sps:$4 sm:$0xff]  }
 0x2cf   :  { %2256 = vmatpush1.bf16.msra.mxu0 %v4012_v7  ;;  %2338 = vmatpush1.bf16.msra.mxu1 %v4015_v8  ;;  %v4101_v7 = vld [vmem:[#allocation10 + $0xf4] ss:$8 sps:$4 sm:$0xff]   ;;  %v4099_v8 = vld [vmem:[#allocation10 + $0xf0] ss:$8 sps:$4 sm:$0xff]  }
 0x2d0   :  { %2257 = vmatprep.subr.bf16.mxu0 %v4020_v9  ;;  %2339 = vmatprep.subr.bf16.mxu1 %v4023_v11  ;;  %v4104_v9 = vld [vmem:[#allocation10 + $0x104] ss:$8 sps:$4 sm:$0xff]  }
 0x2d1   :  { %v4150_v11 = vld [vmem:[#allocation11 + $0x40] sm:$0xff]  }
 0x2d3   :  { %2258 = vmatpush1.bf16.msra.mxu0 %v4018_v13  ;;  %2340 = vmatpush1.bf16.msra.mxu1 %v4021_v14  ;;  %v4151_v13 = vld [vmem:[#allocation11] sm:$0xff]   ;;  %v4152_v14 = vld [vmem:[#allocation11 + $0x48] sm:$0xff]  }
 0x2d4   :  { %2259 = vmatprep.subr.bf16.mxu0 %v4026_v15  ;;  %2341 = vmatprep.subr.bf16.mxu1 %v4029_v17  ;;  %v4153_v15 = vld [vmem:[#allocation11 + $0x8] sm:$0xff]   ;;  %v4154_v17 = vld [vmem:[#allocation11 + $0x50] sm:$0xff]  }
 0x2d7   :  { %2260 = vmatpush1.bf16.msra.mxu0 %v4024_v18  ;;  %2342 = vmatpush1.bf16.msra.mxu1 %v4027_v19  ;;  %v4155_v18 = vld [vmem:[#allocation11 + $0x10] sm:$0xff]   ;;  %v4156_v19 = vld [vmem:[#allocation11 + $0x58] sm:$0xff]  }
 0x2d8   :  { %2261 = vmatprep.subr.bf16.mxu0 %v4032_v20  ;;  %2343 = vmatprep.subr.bf16.mxu1 %v4035_v21  ;;  %v4157_v20 = vld [vmem:[#allocation11 + $0x18] sm:$0xff]   ;;  %v4158_v21 = vld [vmem:[#allocation11 + $0x60] sm:$0xff]  }
 0x2db   :  { %2262 = vmatpush1.bf16.msra.mxu0 %v4030_v22  ;;  %2344 = vmatpush1.bf16.msra.mxu1 %v4033_v23  ;;  %v4159_v22 = vld [vmem:[#allocation11 + $0x20] sm:$0xff]   ;;  %v4160_v23 = vld [vmem:[#allocation11 + $0x68] sm:$0xff]  }
 0x2dc   :  { %2263 = vmatprep.subr.bf16.mxu0 %v4038_v24  ;;  %2345 = vmatprep.subr.bf16.mxu1 %v4041_v25  ;;  %v4161_v24 = vld [vmem:[#allocation11 + $0x28] sm:$0xff]  }
 0x2dd   :  { %v4602_v25 = vld [vmem:[#allocation14 + $0x2] ss:$8 sm:$0xf] }
 0x2de   :  { %v1551_v28 = vrot.slane %v4602_v25, %v4577_v12 }
 0x2df   :  { %2264 = vmatpush1.bf16.msra.mxu0 %v4036_v26  ;;  %2346 = vmatpush1.bf16.msra.mxu1 %v4039_v27  ;;  %v1539_v26 = vrot.slane %v4602_v25, %v4565_v39  ;;  %v1543_v27 = vrot.slane %v4602_v25, %v4570_v41 }
 0x2e0   :  { %2265 = vmatprep.subr.bf16.mxu0 %v4044_v29  ;;  %2347 = vmatprep.subr.bf16.mxu1 %v4047_v30 }
 0x2e3   :  { %2266 = vmatpush1.bf16.msra.mxu0 %v4042_v31  ;;  %2348 = vmatpush1.bf16.msra.mxu1 %v4045_v32 }
 0x2e4   :  { %2267 = vmatprep.subr.bf16.mxu0 %v4050_v34  ;;  %2349 = vmatprep.subr.bf16.mxu1 %v4053_v35 }
 0x2e7   :  { %2268 = vmatpush1.bf16.msra.mxu0 %v4048_v36  ;;  %2350 = vmatpush1.bf16.msra.mxu1 %v4051_v37 }
 0x2e8   :  { %2765 = vmatprep.subr.bf16.mxu0 %v4056_v10  ;;  %3523 = vmatprep.subr.bf16.mxu1 %v4150_v11  ;;  %v4146_v11 = vld [vmem:[#allocation10 + $0x1e4] ss:$8 sps:$4 sm:$0xff]  }
 0x2ea   :  { %2270 = vmatmul.mubr.bf16.vlgmr.msra.gmra.mrb[4].mxu0 %v1405_v44  ;;  %2352 = vmatmul.mubr.bf16.vlgmr.msra.gmra.mrb[12].mxu1 %v1405_v44 }
 0x2eb   :  { %2766 = vmatpush1.bf16.msra.mxu0 %v4054_v43  ;;  %3524 = vmatpush3.bf16.msra.mxu1 %v4151_v13  ;;  %v4144_v13 = vld [vmem:[#allocation10 + $0x1e0] ss:$8 sps:$4 sm:$0xff]  }
 0x2ec   :  { %2767 = vmatprep.subr.bf16.mxu0 %v4059_v45  ;;  %3525 = vmatprep.subr.bf16.mxu1 %v4152_v14 }
 0x2ef   :  { %2768 = vmatpush1.bf16.msra.mxu0 %v4057_v16  ;;  %3526 = vmatpush3.bf16.msra.mxu1 %v4153_v15  ;;  %v4149_v15 = vld [vmem:[#allocation10 + $0x1f4] ss:$8 sps:$4 sm:$0xff]  }
 0x2f0   :  { %2769 = vmatprep.subr.bf16.mxu0 %v4062_v46  ;;  %3527 = vmatprep.subr.bf16.mxu1 %v4154_v17  ;;  %v4102_v46 = vld [vmem:[#allocation10 + $0x100] ss:$8 sps:$4 sm:$0xff]   ;;  %v4147_v17 = vld [vmem:[#allocation10 + $0x1f0] ss:$8 sps:$4 sm:$0xff]  }
 0x2f3   :  { %2770 = vmatpush1.bf16.msra.mxu0 %v4060_v47  ;;  %3528 = vmatpush3.bf16.msra.mxu1 %v4155_v18 }
 0x2f4   :  { %2771 = vmatprep.subr.bf16.mxu0 %v4065_v48  ;;  %3529 = vmatprep.subr.bf16.mxu1 %v4156_v19  ;;  %v4107_v48 = vld [vmem:[#allocation10 + $0x114] ss:$8 sps:$4 sm:$0xff]  }
 0x2f7   :  { %2772 = vmatpush1.bf16.msra.mxu0 %v4063_v49  ;;  %3530 = vmatpush3.bf16.msra.mxu1 %v4157_v20  ;;  %v4105_v49 = vld [vmem:[#allocation10 + $0x110] ss:$8 sps:$4 sm:$0xff]  }
 0x2f8   :  { %2773 = vmatprep.subr.bf16.mxu0 %v4068_v50  ;;  %3531 = vmatprep.subr.bf16.mxu1 %v4158_v21  ;;  %v4110_v50 = vld [vmem:[#allocation10 + $0x124] ss:$8 sps:$4 sm:$0xff]   ;;  %v4162_v20 = vld [vmem:[#allocation11 + $0x70] sm:$0xff]  }
 0x2f9   :  { %v4163_v21 = vld [vmem:[#allocation11 + $0x30] sm:$0xff]  }
 0x2fb   :  { %2774 = vmatpush1.bf16.msra.mxu0 %v4066_v51  ;;  %3532 = vmatpush3.bf16.msra.mxu1 %v4159_v22  ;;  %v4108_v51 = vld [vmem:[#allocation10 + $0x120] ss:$8 sps:$4 sm:$0xff]   ;;  %v4165_v22 = vld [vmem:[#allocation11 + $0x38] sm:$0xff]  }
 0x2fc   :  { %2775 = vmatprep.subr.bf16.mxu0 %v4071_v52  ;;  %3533 = vmatprep.subr.bf16.mxu1 %v4160_v23  ;;  %v4113_v52 = vld [vmem:[#allocation10 + $0x134] ss:$8 sps:$4 sm:$0xff]   ;;  %v4399_v23 = vmov 0.0  }
 0x2ff   :  { %2776 = vmatpush1.bf16.msra.mxu0 %v4069_v54  ;;  %3534 = vmatpush3.bf16.msra.mxu1 %v4161_v24  ;;  %v4111_v54 = vld [vmem:[#allocation10 + $0x130] ss:$8 sps:$4 sm:$0xff]   ;;  %v2365_v24 = vld [vmem:[#allocation14 + $0x3] ss:$8 sm:$0x3] }
 0x300   :  { %2777 = vmatprep.subr.bf16.mxu0 %v4074_v55  ;;  %v4116_v55 = vld [vmem:[#allocation10 + $0x144] ss:$8 sps:$4 sm:$0xff]   ;;  %3535 = vmatprep.subr.bf16.mxu1 %v4162_v20 }
 0x303   :  { %2778 = vmatpush1.bf16.msra.mxu0 %v4072_v56  ;;  %v4114_v56 = vld [vmem:[#allocation10 + $0x140] ss:$8 sps:$4 sm:$0xff]   ;;  %3536 = vmatpush3.bf16.msra.mxu1 %v4163_v21 }
 0x304   :  { %2779 = vmatprep.subr.bf16.mxu0 %v4077_v57  ;;  %v4119_v57 = vld [vmem:[#allocation10 + $0x154] ss:$8 sps:$4 sm:$0xff]  }
 0x307   :  { %2780 = vmatpush1.bf16.msra.mxu0 %v4075_v58  ;;  %v4117_v58 = vld [vmem:[#allocation10 + $0x150] ss:$8 sps:$4 sm:$0xff]  }
 0x308   :  { %2781 = vmatprep.subr.bf16.mxu0 %v4080_v59  ;;  %v4122_v59 = vld [vmem:[#allocation10 + $0x164] ss:$8 sps:$4 sm:$0xff]  }
 0x30b   :  { %2782 = vmatpush1.bf16.msra.mxu0 %v4078_v60  ;;  %v4120_v60 = vld [vmem:[#allocation10 + $0x160] ss:$8 sps:$4 sm:$0xff]  }
 0x30c   :  { %2783 = vmatprep.subr.bf16.mxu0 %v4083_v61  ;;  %v4125_v61 = vld [vmem:[#allocation10 + $0x174] ss:$8 sps:$4 sm:$0xff]  }
 0x30f   :  { %2784 = vmatpush1.bf16.msra.mxu0 %v4081_v62  ;;  %v4123_v62 = vld [vmem:[#allocation10 + $0x170] ss:$8 sps:$4 sm:$0xff]  }
 0x310   :  { %2785 = vmatprep.subr.bf16.mxu0 %v4086_v38  ;;  %v4128_v38 = vld [vmem:[#allocation10 + $0x184] ss:$8 sps:$4 sm:$0xff]  }
 0x313   :  { %2786 = vmatpush1.bf16.msra.mxu0 %v4084_v63  ;;  %v4126_v63 = vld [vmem:[#allocation10 + $0x180] ss:$8 sps:$4 sm:$0xff]  }
 0x314   :  { %2787 = vmatprep.subr.bf16.mxu0 %v4089_v0  ;;  %v4131_v0 = vld [vmem:[#allocation10 + $0x194] ss:$8 sps:$4 sm:$0xff]  }
 0x317   :  { %2788 = vmatpush1.bf16.msra.mxu0 %v4087_v1  ;;  %v4129_v1 = vld [vmem:[#allocation10 + $0x190] ss:$8 sps:$4 sm:$0xff]  }
 0x318   :  { %2789 = vmatprep.subr.bf16.mxu0 %v4092_v2  ;;  %v4134_v2 = vld [vmem:[#allocation10 + $0x1a4] ss:$8 sps:$4 sm:$0xff]  }
 0x31b   :  { %2790 = vmatpush1.bf16.msra.mxu0 %v4090_v3  ;;  %v4132_v3 = vld [vmem:[#allocation10 + $0x1a0] ss:$8 sps:$4 sm:$0xff]  }
 0x31c   :  { %2791 = vmatprep.subr.bf16.mxu0 %v4095_v40  ;;  %v4137_v40 = vld [vmem:[#allocation10 + $0x1b4] ss:$8 sps:$4 sm:$0xff]  }
 0x31f   :  { %2792 = vmatpush1.bf16.msra.mxu0 %v4093_v4  ;;  %v4135_v4 = vld [vmem:[#allocation10 + $0x1b0] ss:$8 sps:$4 sm:$0xff]  }
 0x320   :  { %2793 = vmatprep.subr.bf16.mxu0 %v4098_v5  ;;  %v4140_v5 = vld [vmem:[#allocation10 + $0x1c4] ss:$8 sps:$4 sm:$0xff]  }
 0x323   :  { %2794 = vmatpush1.bf16.msra.mxu0 %v4096_v6  ;;  %v4138_v6 = vld [vmem:[#allocation10 + $0x1c0] ss:$8 sps:$4 sm:$0xff]  }
 0x324   :  { %2795 = vmatprep.subr.bf16.mxu0 %v4101_v7  ;;  %v4143_v7 = vld [vmem:[#allocation10 + $0x1d4] ss:$8 sps:$4 sm:$0xff]  }
 0x327   :  { %2796 = vmatpush1.bf16.msra.mxu0 %v4099_v8  ;;  %v4141_v8 = vld [vmem:[#allocation10 + $0x1d0] ss:$8 sps:$4 sm:$0xff]  }
 0x328   :  { %2806 = vmatprep.subr.bf16.mxu0 %v4104_v9  ;;  %v1547_v9 = vrot.slane %v4602_v25, %v4584_v53  ;;  %v4164_v53 = vld [vmem:[#allocation11 + $0x78] sm:$0xff]   ;;  %v2438_v25 = vrot.slane %v2365_v24, %v4565_v39  ;;  %v4168_v39 = vld [vmem:[#allocation13 + $0x10] sm:$0xff]  }
 0x329   :  { %3537 = vmatprep.subr.bf16.mxu1 %v4164_v53 }
 0x32a   :  { %3538 = vmatpush3.bf16.msra.mxu1 %v4165_v22 }
 0x32b   :  { %3554 = vmatprep.subr.bf16.mxu1 %v4399_v23 }
 0x3bd   :  { %v2271_v29 = vpop.f32.mrb[4].mxu0  ;;  %v4610_v30 = vpop.f32.mrb[12].mxu1 }
 0x3be   :  { %v3578_v31 = vadd.f32 %v2271_v29, %v1539_v26  ;;  %v2273_v32 = vpop.f32.mrb[5].mxu0  ;;  %v2355_v33 = vpop.f32.mrb[13].mxu1  ;;  %v3580_v14 = vadd.f32 %v4610_v30, %v1547_v9  ;;  %v2442_v26 = vrot.slane %v2365_v24, %v4570_v41  ;;  %v4169_v41 = vld [vmem:[#allocation13 + $0x18] sm:$0xff]  }
 0x3bf   :  { %v3579_v34 = vadd.f32 %v2273_v32, %v1543_v27  ;;  %v3581_v35 = vadd.f32 %v2355_v33, %v1551_v28  ;;  %v2275_v36 = vpop.f32.mrb[6].mxu0  ;;  %v2357_v37 = vpop.f32.mrb[14].mxu1 }
 0x3c0   :  { %v2360_v42 = vmax.f32 %v3578_v31, 0.0  ;;  %v2276_v10 = vpop.f32.mrb[7].mxu0  ;;  %v2358_v43 = vpop.f32.mrb[15].mxu1  ;;  %v2362_v18 = vmax.f32 %v3580_v14, 0.0  ;;  %v4166_v36 = vld [vmem:[#allocation13] sm:$0xff]  }
 0x3c1   :  { %v2361_v44 = vmax.f32 %v3579_v34, 0.0  ;;  %v2363_v45 = vmax.f32 %v3581_v35, 0.0  ;;  %v4170_v10 = vld [vmem:[#allocation13 + $0x20] sm:$0xff]   ;;  %v4171_v43 = vld [vmem:[#allocation13 + $0x28] sm:$0xff]  }
 0x3c2   :  { %v2366_v47 = vpack.c.bf16 %v2360_v42, %v2360_v42  ;;  %v2368_v19 = vpack.c.bf16 %v2362_v18, %v2362_v18  ;;  %v4167_v42 = vld [vmem:[#allocation13 + $0x8] sm:$0xff]  }
 0x3c3   :  { %v2367_v16 = vpack.c.bf16 %v2361_v44, %v2361_v44  ;;  %v2369_v12 = vpack.c.bf16 %v2363_v45, %v2363_v45  ;;  %v4172_v44 = vld [vmem:[#allocation13 + $0x30] sm:$0xff]   ;;  %v4173_v45 = vld [vmem:[#allocation13 + $0x38] sm:$0xff]  }
 0x3c5   :  { %2797 = vmatprep.mubr.bf16.mxu0 %v2367_v16 }
 0x3c6   :  { %2798 = vmatmul.mubr.bf16.vlgmr.msra.gmra.mrb[8].mxu0 %v2366_v47 }
 0x3c7   :  { %2807 = vmatpush1.bf16.msra.mxu0 %v4102_v46  ;;  %2838 = vmatprep.mubr.bf16.mxu0 %v2369_v12  ;;  %v2849_v46 = vld [vmem:[#allocation14 + $0x4] ss:$0 sm:$0xff] }
 0x3c8   :  { %2808 = vmatprep.subr.bf16.mxu0 %v4107_v48 }
 0x3cb   :  { %2809 = vmatpush1.bf16.msra.mxu0 %v4105_v49 }
 0x3cc   :  { %2810 = vmatprep.subr.bf16.mxu0 %v4110_v50 }
 0x3cf   :  { %2811 = vmatpush1.bf16.msra.mxu0 %v4108_v51 }
 0x3d0   :  { %2812 = vmatprep.subr.bf16.mxu0 %v4113_v52 }
 0x3d3   :  { %2813 = vmatpush1.bf16.msra.mxu0 %v4111_v54  ;;  %v3021_v54 = vld [vmem:[#allocation14 + $0x5] ss:$0 sm:$0xff] }
 0x3d4   :  { %2814 = vmatprep.subr.bf16.mxu0 %v4116_v55 }
 0x3d7   :  { %2815 = vmatpush1.bf16.msra.mxu0 %v4114_v56 }
 0x3d8   :  { %2816 = vmatprep.subr.bf16.mxu0 %v4119_v57 }
 0x3db   :  { %2817 = vmatpush1.bf16.msra.mxu0 %v4117_v58 }
 0x3dc   :  { %2818 = vmatprep.subr.bf16.mxu0 %v4122_v59 }
 0x3df   :  { %2819 = vmatpush1.bf16.msra.mxu0 %v4120_v60 }
 0x3e0   :  { %2820 = vmatprep.subr.bf16.mxu0 %v4125_v61 }
 0x3e3   :  { %2821 = vmatpush1.bf16.msra.mxu0 %v4123_v62 }
 0x3e4   :  { %2822 = vmatprep.subr.bf16.mxu0 %v4128_v38 }
 0x3e7   :  { %2823 = vmatpush1.bf16.msra.mxu0 %v4126_v63 }
 0x3e8   :  { %2824 = vmatprep.subr.bf16.mxu0 %v4131_v0 }
 0x3eb   :  { %2825 = vmatpush1.bf16.msra.mxu0 %v4129_v1 }
 0x3ec   :  { %2826 = vmatprep.subr.bf16.mxu0 %v4134_v2 }
 0x3ef   :  { %2827 = vmatpush1.bf16.msra.mxu0 %v4132_v3 }
 0x3f0   :  { %2828 = vmatprep.subr.bf16.mxu0 %v4137_v40 }
 0x3f3   :  { %2829 = vmatpush1.bf16.msra.mxu0 %v4135_v4 }
 0x3f4   :  { %2830 = vmatprep.subr.bf16.mxu0 %v4140_v5 }
 0x3f7   :  { %2831 = vmatpush1.bf16.msra.mxu0 %v4138_v6 }
 0x3f8   :  { %2832 = vmatprep.subr.bf16.mxu0 %v4143_v7 }
 0x3fb   :  { %2833 = vmatpush1.bf16.msra.mxu0 %v4141_v8 }
 0x3fc   :  { %2834 = vmatprep.subr.bf16.mxu0 %v4146_v11 }
 0x3ff   :  { %2835 = vmatpush1.bf16.msra.mxu0 %v4144_v13 }
 0x400   :  { %2836 = vmatprep.subr.bf16.mxu0 %v4149_v15 }
 0x403   :  { %2837 = vmatpush1.bf16.msra.mxu0 %v4147_v17 }
 0x406   :  { %2839 = vmatmul.mubr.bf16.vlgmr.msra.gmra.mrb[8].mxu0 %v2368_v19 }
 0x4d9   :  { %v2840_v27 = vpop.f32.mrb[8].mxu0 }
 0x4da   :  { %v3582_v28 = vadd.f32 %v2840_v27, %v2438_v25  ;;  %v2842_v29 = vpop.f32.mrb[9].mxu0 }
 0x4db   :  { %v3583_v30 = vadd.f32 %v2842_v29, %v2442_v26  ;;  %v2844_v31 = vpop.f32.mrb[10].mxu0 }
 0x4dc   :  { %v2847_v32 = vmax.f32 %v3582_v28, 0.0  ;;  %v2845_v33 = vpop.f32.mrb[11].mxu0 }
 0x4dd   :  { %v2848_v34 = vmax.f32 %v3583_v30, 0.0 }
 0x4de   :  { %v2850_v37 = vpack.c.bf16 %v2847_v32, %v2847_v32 }
 0x4df   :  { %v2851_v35 = vpack.c.bf16 %v2848_v34, %v2848_v34 }
 0x4e1   :  { %3012 = vmatprep.mubr.bf16.mxu1 %v2851_v35 }
 0x4e2   :  { %3013 = vmatmul.mubr.bf16.vlgmr.msra.gmra.mrb[16].mxu1 %v2850_v37 }
 0x4e3   :  { %3555 = vmatpush3.bf16.msra.mxu1 %v4166_v36  ;;  %3570 = vmatprep.mubr.msk.bf16.mxu1 %vm4400_vm0, %v4399_v23 }
 0x4e4   :  { %3556 = vmatprep.subr.bf16.mxu1 %v4399_v23 }
 0x4e7   :  { %3557 = vmatpush3.bf16.msra.mxu1 %v4167_v42 }
 0x4e8   :  { %3558 = vmatprep.subr.bf16.mxu1 %v4399_v23 }
 0x4eb   :  { %3559 = vmatpush3.bf16.msra.mxu1 %v4168_v39 }
 0x4ec   :  { %3560 = vmatprep.subr.bf16.mxu1 %v4399_v23 }
 0x4ef   :  { %3561 = vmatpush3.bf16.msra.mxu1 %v4169_v41 }
 0x4f0   :  { %3562 = vmatprep.subr.bf16.mxu1 %v4399_v23 }
 0x4f3   :  { %3563 = vmatpush3.bf16.msra.mxu1 %v4170_v10 }
 0x4f4   :  { %3564 = vmatprep.subr.bf16.mxu1 %v4399_v23 }
 0x4f7   :  { %3565 = vmatpush3.bf16.msra.mxu1 %v4171_v43 }
 0x4f8   :  { %3566 = vmatprep.subr.bf16.mxu1 %v4399_v23 }
 0x4fb   :  { %3567 = vmatpush3.bf16.msra.mxu1 %v4172_v44 }
 0x4fc   :  { %3568 = vmatprep.subr.bf16.mxu1 %v4399_v23 }
 0x4ff   :  { %3569 = vmatpush3.bf16.msra.mxu1 %v4173_v45 }
 0x5b5   :  { %v3539_v16 = vpop.f32.mrb[16].mxu1 }
 0x5b6   :  { %v3540_v47 = vpop.f32.mrb[17].mxu1 }
 0x5b7   :  { %v3541_v48 = vadd.f32 %v3540_v47, %v3539_v16  ;;  %v3542_v12 = vpop.f32.mrb[18].mxu1 }
 0x5b8   :  { %v3543_v49 = vpop.f32.mrb[19].mxu1 }
 0x5b9   :  { %v3015_v50 = vadd.f32 %v3541_v48, %v2849_v46 }
 0x5bb   :  { %v3020_v51 = vmax.f32 %v3015_v50, 0.0 }
 0x5bd   :  { %v3022_v52 = vpack.c.bf16 %v3020_v51, %v3020_v51 }
 0x5bf   :  { %3571 = vmatmul.mubr.bf16.vlgmr.msra.gmra.mrb[20].mxu1 %v3022_v52 }
 0x692   :  { %v3121_v55 = vpop.f32.mrb[20].mxu1 }
 0x693   :  { %v3122_v56 = vadd.f32 %v3121_v55, %v3021_v54  ;;  %v3572_v57 = vpop.f32.mrb[21].mxu1 }
 0x694   :  { %v3124_v58 = vpop.f32.mrb[22].mxu1 }
 0x695   :  { %3127 = vst [vmem:[#allocation16] sm:$0xff] %v3122_v56  ;;  %v3573_v59 = vpop.f32.mrb[23].mxu1 }
 0x696   :  { %4361 = shalt.err (!%p4358_p12)
}
 0x697   :  { %s4362_s27 = scalar_lea.hbm %s4637_s8, 128 }
 0x698   :  { %p4363_p13 = scmp.ne.s32.totalorder %s4637_s8, %s4362_s27  ;;  %p4366_p0 = scmp.lt.u32.totalorder %s4362_s27, %s4637_s8 }
 0x69a   :  { %p4368_p1 = pnand %p4366_p0, %p4363_p13 }
 0x69c   :  { %4371 = shalt.err (!%p4368_p1)
}
 0x69d   :  { %3137 = dma.vmem_to_hbm [thread:$0]  %s3135_s20, 128, %s4637_s8, [#allocation4]  }
 0x69e   :  { %4382 = dma.done.wait [#allocation4], 128  }
 0x69f   :  { %4383 = vsyncadd [#allocation4], 4294967168 }
 0x6a0   :  { %3141 = vsyncpa [#allocation3], 1 }
 0x6a1   :  { %3142 = vsyncpa [#allocation6], 1 }
 0x6a2   :  { %3143 = vsyncpa [#allocation9], 1 }
 0x6a3   :  { %3144 = vsyncpa [#allocation12], 1 }
 0x6a4   :  { %3145 = vsyncpa [#allocation15], 1 }
 0x6a5   :  { %3146 = vsyncpa [#allocation4], 1 }

</bundles_post_ra>
